<compile_context>
chip_gen: v7x
topology: tpu7x:2x2x1
jax: 0.10.0
libtpu: 0.0.40
codegen_flags: <defaults>
</compile_context>

<pallas_src>
from types import SimpleNamespace

import jax
import jax.numpy as jnp
from jax.experimental import pallas as pl
from jax.experimental.pallas import tpu as pltpu


# ----------------------------------------------------------------------------------
# Kernel 1: per-head classification loss + class_error + cardinality_error.
#   logits  [H, B, Q, K]   native dtype, native layout (classes on lanes)
#   tclass  [H, B, Q, 1]   int32 target class per query
#   mmask   [H, B, Q, 1]   f32 matched-query mask
#   out     [H, 8, 128]    lane 0 = loss_ce, lane 1 = class_error, lane 2 = card_err
# ----------------------------------------------------------------------------------
def _make_label_kernel(eos_coef, tgt_len, inv_batch, inv_n_matched):
    eos_coef = float(eos_coef)
    tgt_len = float(tgt_len)
    inv_batch = float(inv_batch)
    inv_n_matched = float(inv_n_matched)

    def kernel(logits_ref, tclass_ref, mask_ref, out_ref):
        x = logits_ref[0].astype(jnp.float32)          # [B, Q, K]
        t = tclass_ref[0]                              # [B, Q, 1] int32
        mm = mask_ref[0]                               # [B, Q, 1] f32
        B, Q, K = x.shape

        kio = jax.lax.broadcasted_iota(jnp.int32, (B, Q, K), 2)
        onehot = (kio == t).astype(jnp.float32)

        # weighted NLL == F.cross_entropy(..., weight=empty_weight), 'mean' = sum / sum(w)
        m = jnp.max(x, axis=2, keepdims=True)                                   # [B,Q,1]
        lse = m + jnp.log(jnp.sum(jnp.exp(x - m), axis=2, keepdims=True))       # [B,Q,1]
        x_t = jnp.sum(onehot * x, axis=2, keepdims=True)                        # [B,Q,1]
        w_t = jnp.where(t == K - 1, eos_coef, 1.0).astype(jnp.float32)          # [B,Q,1]
        nll = lse - x_t

        # first-occurrence argmax over classes (lane reduce, matches torch tie-break)
        am = jnp.min(jnp.where(x == m, kio.astype(jnp.float32), float(K)),
                     axis=2, keepdims=True)                                     # [B,Q,1]
        notempty = (am != float(K - 1)).astype(jnp.float32)
        correct = mm * (am == t.astype(jnp.float32)).astype(jnp.float32)

        # reduce over queries (sublane axis), then over batch (leading axis)
        num = jnp.sum(jnp.sum(w_t * nll, axis=1, keepdims=True), axis=0)        # [1,1]
        den = jnp.sum(jnp.sum(w_t, axis=1, keepdims=True), axis=0)              # [1,1]
        cnt_b = jnp.sum(notempty, axis=1, keepdims=True)                        # [B,1,1]
        card = jnp.sum(jnp.abs(cnt_b - tgt_len), axis=0) * inv_batch            # [1,1]
        cor = jnp.sum(jnp.sum(correct, axis=1, keepdims=True), axis=0)          # [1,1]

        loss_ce = num / den
        class_err = 100.0 - cor * (100.0 * inv_n_matched)

        lane = jax.lax.broadcasted_iota(jnp.int32, (1, 128), 1)
        row = (jnp.where(lane == 0, loss_ce, 0.0)
               + jnp.where(lane == 1, class_err, 0.0)
               + jnp.where(lane == 2, card, 0.0))                               # (1,128)
        out_ref[...] = jnp.broadcast_to(row, out_ref.shape)                     # (1,8,128)

    return kernel


def _run_label_kernel(logits, tclass, mmask, *, eos_coef, tgt_len, n_matched):
    H, B, Q, K = logits.shape
    kernel = _make_label_kernel(eos_coef, tgt_len, 1.0 / float(B),
                                1.0 / float(max(int(n_matched), 1)))
    return pl.pallas_call(
        kernel,
        out_shape=jax.ShapeDtypeStruct((H, 8, 128), jnp.float32),
        grid=(H,),
        in_specs=[
            pl.BlockSpec((1, B, Q, K), lambda h: (h, 0, 0, 0)),   # full batch per head
            pl.BlockSpec((1, B, Q, 1), lambda h: (h, 0, 0, 0)),
            pl.BlockSpec((1, B, Q, 1), lambda h: (h, 0, 0, 0)),
        ],
        out_specs=pl.BlockSpec((1, 8, 128), lambda h: (h, 0, 0)),
        compiler_params=pltpu.CompilerParams(
            dimension_semantics=("parallel",)),
    )(logits, tclass, mmask)


# ----------------------------------------------------------------------------------
# Kernel 2: per-head box losses (poly eval + 3D->image projection + masked weighted L1).
#   boxdata [H, C, N] with boxes on the 128-lane axis.  Row layout (C = P + T + 2 + S):
#     rows 0:P        matched pred_boxes, transposed          (P params on sublanes)
#     rows P:P+T      matched targets, transposed             (T target columns)
#     row  P+T        target cam heights
#     row  P+T+1      target cam pitches
#     rows P+T+2:..   target flags, transposed                (S sequence points)
#   out [H, 8, 128]: lanes 0..9 hold the ten scalar losses.
# ----------------------------------------------------------------------------------
def _make_box_kernel(num_boxes, gX, gY, gZ, P, T, S):
    inv_nb = 1.0 / float(num_boxes)        # baked trace-time constants, no runtime divides
    gX, gY, gZ = float(gX), float(gY), float(gZ)
    inv_gX, inv_gY = 1.0 / gX, 1.0 / gY
    t0 = P                                  # first target row
    e0 = P + T                              # first extras row

    def kernel(box_ref, out_ref):
        src_s3d_low = box_ref[0, 2:3, :]                      # [1, N]
        src_s3d_up = box_ref[0, 3:4, :]
        polys = box_ref[0, 4:8, :]                            # [4, N]
        poly2 = box_ref[0, 8:12, :]
        cam_h = box_ref[0, P - 2:P - 1, :]                    # [1, N]
        cam_p = box_ref[0, P - 1:P, :]

        tgt_xs = box_ref[0, t0 + 3:t0 + 3 + S, :]             # [S, N]
        tgt_ys = box_ref[0, t0 + 3 + S:t0 + 3 + 2 * S, :]
        t_s3d_low = box_ref[0, t0 + 3 + 2 * S:t0 + 4 + 2 * S, :]
        t_s3d_up = box_ref[0, t0 + 4 + 2 * S:t0 + 5 + 2 * S, :]
        s3d_XS = box_ref[0, t0 + 5 + 2 * S:t0 + 5 + 3 * S, :]
        s3d_YS = box_ref[0, t0 + 5 + 3 * S:t0 + 5 + 4 * S, :]
        s3d_ZS = box_ref[0, t0 + 5 + 4 * S:t0 + 5 + 5 * S, :]
        gflat_XS = box_ref[0, t0 + 5 + 5 * S:t0 + 5 + 6 * S, :]
        gflat_YS = box_ref[0, t0 + 5 + 6 * S:t0 + 5 + 7 * S, :]

        tgt_h = box_ref[0, e0:e0 + 1, :]                      # [1, N]
        tgt_p = box_ref[0, e0 + 1:e0 + 2, :]
        flags = box_ref[0, e0 + 2:e0 + 2 + S, :]              # [S, N]

        valid = flags > 0.0
        validf = valid.astype(jnp.float32)
        rowv = jnp.sum(validf, axis=0, keepdims=True)         # [1, N] valid points per box
        total = jnp.sum(rowv, axis=1, keepdims=True)          # [1, 1]
        # TODO(synk): a box with zero valid points gives inf/nan weights, as in the reference.
        w = jnp.sqrt(total * pl.reciprocal(rowv, approx=True))               # [1, N]
        w = w * pl.reciprocal(jnp.max(w, axis=1, keepdims=True), approx=True)

        YS = s3d_YS
        YS2 = YS * YS
        YS3 = YS2 * YS
        pred_XS = polys[0:1] * YS3 + polys[1:2] * YS2 + polys[2:3] * YS + polys[3:4]
        pred_ZS = poly2[0:1] * YS3 + poly2[1:2] * YS2 + poly2[2:3] * YS + poly2[3:4]

        # 3D -> image projection; per-element divides live on the EUP (approx reciprocal).
        inv_denom = pl.reciprocal(cam_h - pred_ZS * gZ, approx=True)         # [S, N]
        tgx = pred_XS * (gX * cam_h) * inv_denom
        tgy = YS * (gY * cam_h) * inv_denom
        cosb = jnp.cos(cam_p)
        sinb = jnp.sin(cam_p)
        inv_ph = pl.reciprocal(cosb * tgy, approx=True)                      # [S, N]
        px = (2015.0 * tgx + 960.0 * cosb * tgy) * inv_ph
        py = ((2015.0 * (-sinb) + 540.0 * cosb) * tgy + 2015.0 * cam_h) * inv_ph

        def full_sum(a):
            return jnp.sum(jnp.sum(a, axis=1, keepdims=True), axis=0, keepdims=True)

        def masked_l1(a, b):
            v = jnp.where(valid, jnp.abs(a - b) * w, 0.0)
            return full_sum(v) * inv_nb

        vals = [
            masked_l1(pred_XS, s3d_XS),                                  # loss_3dspace_XS
            masked_l1(pred_ZS, s3d_ZS),                                  # loss_3dspace_ZS
            full_sum(jnp.abs(src_s3d_low - t_s3d_low)) * inv_nb,         # loss_3dspace_lowers
            full_sum(jnp.abs(src_s3d_up - t_s3d_up)) * inv_nb,           # loss_3dspace_uppers
            masked_l1(tgx * inv_gX, gflat_XS),                           # loss_gflat_XS
            masked_l1(tgy * inv_gY, gflat_YS),                           # loss_gflat_YS
            masked_l1(px * (1.0 / 1920.0), tgt_xs),                      # loss_polys
            masked_l1(py * (1.0 / 1080.0), tgt_ys),                      # loss_ys
            full_sum(jnp.abs(cam_h - tgt_h)) * inv_nb,                   # loss_cam_heights
            full_sum(jnp.abs(cam_p - tgt_p)) * inv_nb,                   # loss_cam_pitches
        ]

        lane = jax.lax.broadcasted_iota(jnp.int32, (1, 128), 1)
        row = jnp.zeros((1, 128), jnp.float32)
        for i, v in enumerate(vals):
            row = row + jnp.where(lane == i, v, 0.0)
        out_ref[...] = jnp.broadcast_to(row, out_ref.shape)              # single full-tile store

    return kernel


def _run_box_kernel(boxdata, *, num_boxes, gX, gY, gZ, P, T, S):
    H, C, N = boxdata.shape
    kernel = _make_box_kernel(num_boxes, gX, gY, gZ, P, T, S)
    return pl.pallas_call(
        kernel,
        out_shape=jax.ShapeDtypeStruct((H, 8, 128), jnp.float32),
        grid=(H,),
        in_specs=[pl.BlockSpec((1, C, N), lambda h: (h, 0, 0))],
        out_specs=pl.BlockSpec((1, 8, 128), lambda h: (h, 0, 0)),
        compiler_params=pltpu.CompilerParams(dimension_semantics=("parallel",)),
    )(boxdata)


# ----------------------------------------------------------------------------------
# Matcher stub (dependency injected into SetCriterion in the original code).
# ----------------------------------------------------------------------------------
def simple_identity_matcher(outputs, targets, targets_flag):
    # TODO(synk): Hungarian assignment (scipy.optimize.linear_sum_assignment) has no clean
    # Pallas/TPU (jit-traceable) equivalent; use a deterministic identity matching instead.
    B, n_tgt = targets.shape[0], targets.shape[1]
    idx = jnp.arange(n_tgt, dtype=jnp.int32)
    return [(idx, idx) for _ in range(B)]


# ----------------------------------------------------------------------------------
# SetCriterion wrapper: glue (gathers / stacking) in plain JAX under one jit,
# math in two batched Pallas kernels.
# ----------------------------------------------------------------------------------
class SetCriterionPallas:
    BOX_LOSS_NAMES = ('loss_3dspace_XS', 'loss_3dspace_ZS', 'loss_3dspace_lowers',
                      'loss_3dspace_uppers', 'loss_gflat_XS', 'loss_gflat_YS',
                      'loss_polys', 'loss_ys', 'loss_cam_heights', 'loss_cam_pitches')

    def __init__(self, num_classes, matcher, weight_dict, eos_coef, losses, seq_len, db=None):
        self.num_classes = num_classes
        self.matcher = matcher
        self.weight_dict = weight_dict
        self.eos_coef = eos_coef
        self.losses = losses
        self.seq_len = seq_len
        self.db = db
        self.empty_weight = jnp.ones(num_classes + 1, jnp.float32).at[-1].set(eos_coef)
        # One jit over the whole loss forward: the per-head gathers/concats fuse and the
        # two pallas_calls (labels + boxes, each batched over heads) are the only kernels.
        self._jit_forward = jax.jit(self._forward_impl)

    # ---- permutation helpers (mirror the torch code) ----
    def _get_src_permutation_idx(self, indices):
        batch_idx = jnp.concatenate([jnp.full_like(src, i) for i, (src, _) in enumerate(indices)])
        src_idx = jnp.concatenate([src for src, _ in indices])
        return batch_idx, src_idx

    def _get_tgt_permutation_idx(self, indices):
        batch_idx = jnp.concatenate([jnp.full_like(tgt, i) for i, (_, tgt) in enumerate(indices)])
        tgt_idx = jnp.concatenate([tgt for _, tgt in indices])
        return batch_idx, tgt_idx

    # ---- batched kernel-input builders ----
    def _build_label_inputs(self, head_outputs, head_indices, targets):
        B, Q, _ = head_outputs[0]['pred_logits'].shape
        logits = jnp.stack([h['pred_logits'] for h in head_outputs])           # [H,B,Q,K]
        tcls, mask = [], []
        for inds in head_indices:
            batch_idx, src_idx = self._get_src_permutation_idx(inds)
            tbatch_idx, tgt_idx = self._get_tgt_permutation_idx(inds)
            tco = targets[tbatch_idx, tgt_idx, 0].astype(jnp.int32)
            tcls.append(jnp.full((B, Q), self.num_classes, jnp.int32)
                        .at[batch_idx, src_idx].set(tco))
            mask.append(jnp.zeros((B, Q), jnp.float32).at[batch_idx, src_idx].set(1.0))
        return logits, jnp.stack(tcls)[..., None], jnp.stack(mask)[..., None]

    def _build_box_inputs(self, head_outputs, head_indices, targets, target_flags,
                          heights, pitches):
        per_head = []
        for out_h, inds in zip(head_outputs, head_indices):
            batch_idx, src_idx = self._get_src_permutation_idx(inds)
            tbatch_idx, tgt_idx = self._get_tgt_permutation_idx(inds)
            mp = out_h['pred_boxes'][batch_idx, src_idx].astype(jnp.float32)   # [N, P]
            mt = targets[tbatch_idx, tgt_idx].astype(jnp.float32)              # [N, T]
            mfl = target_flags[tbatch_idx, tgt_idx].astype(jnp.float32)        # [N, S]
            mh = heights[tbatch_idx, tgt_idx].astype(jnp.float32)              # [N]
            mpit = pitches[tbatch_idx, tgt_idx].astype(jnp.float32)            # [N]
            # coalesced, lane-dense layout (boxes on the 128-lane axis): [C, N]
            per_head.append(jnp.concatenate(
                [mp.T, mt.T, mh[None, :], mpit[None, :], mfl.T], axis=0))
        return jnp.stack(per_head)                                             # [H, C, N]

    # ---- the whole forward, traced once under jit ----
    def _forward_impl(self, outputs, targets, targets_flag, heights, pitches):
        outputs_without_aux = {k: v for k, v in outputs.items() if k != 'aux_outputs'}

        head_outputs = [outputs_without_aux]
        head_indices = [self.matcher(outputs_without_aux, targets, targets_flag)]
        for aux in outputs.get('aux_outputs', []):
            head_outputs.append(aux)
            head_indices.append(self.matcher(aux, targets, targets_flag))
        H = len(head_outputs)

        B, n_tgt, T = targets.shape
        S = (T - 5) // 8
        self.seq_len = S
        P = head_outputs[0]['pred_boxes'].shape[-1]
        # TODO(synk): distributed all_reduce / world_size omitted (single host); dense
        # [B, n_tgt, ...] targets mean num_boxes / per-image counts use padded rows
        # (the list-of-dicts reference uses true per-image counts).
        num_boxes = max(float(B * n_tgt), 1.0)
        n_matched = B * n_tgt                 # identical for every head

        if 'masks' in self.losses:
            # TODO(synk): masks loss needs nested_tensor_from_tensor_list + bilinear
            # interpolation; no clean Pallas equivalent implemented here.
            raise NotImplementedError("masks loss not implemented")

        want_labels = 'labels' in self.losses
        want_card = 'cardinality' in self.losses
        want_boxes = 'boxes' in self.losses

        label_out = None
        if want_labels or want_card:
            logits, tclass, mmask = self._build_label_inputs(head_outputs, head_indices, targets)
            label_out = _run_label_kernel(logits, tclass, mmask,
                                          eos_coef=self.eos_coef, tgt_len=float(n_tgt),
                                          n_matched=n_matched)

        box_out = None
        if want_boxes:
            boxdata = self._build_box_inputs(head_outputs, head_indices, targets,
                                             targets_flag, heights, pitches)
            box_out = _run_box_kernel(boxdata, num_boxes=num_boxes,
                                      gX=self.db.gflatXnorm, gY=self.db.gflatYnorm,
                                      gZ=self.db.gflatZnorm, P=P, T=T, S=S)

        losses = {}
        for h in range(H):
            sfx = '' if h == 0 else f'_{h - 1}'
            if want_labels:
                losses['loss_ce' + sfx] = label_out[h, 0, 0]
                if h == 0:                       # log=True only for the main head
                    losses['class_error'] = label_out[h, 0, 1]
            if want_card:
                losses['cardinality_error' + sfx] = label_out[h, 0, 2]
            if want_boxes:
                for i, name in enumerate(self.BOX_LOSS_NAMES):
                    losses[name + sfx] = box_out[h, 0, i]

        # the torch reference returns the indices from the last matcher call
        return losses, head_indices[-1]

    def forward(self, outputs, targets, targets_flag, heights, pitches):
        return self._jit_forward(outputs, targets, targets_flag, heights, pitches)


# ----------------------------------------------------------------------------------
if __name__ == "__main__":
    key = jax.random.PRNGKey(0)
    B, Q, num_classes = 2, 8, 3
    K = num_classes + 1
    n_tgt, S = 3, 8
    T = 5 + 8 * S                      # 69 target columns
    P = 14                             # pred_boxes columns

    def make_pred(k):
        ks = jax.random.split(k, 6)
        logits = jax.random.normal(ks[0], (B, Q, K), jnp.float32)
        lowers_uppers = jax.random.uniform(ks[1], (B, Q, 4), minval=0.1, maxval=1.0)
        polys = 0.1 * jax.random.normal(ks[2], (B, Q, 4))
        poly2 = 0.05 * jax.random.normal(ks[3], (B, Q, 4))
        cam_h = jax.random.uniform(ks[4], (B, Q, 1), minval=1.0, maxval=2.0)
        cam_p = jax.random.uniform(ks[5], (B, Q, 1), minval=-0.1, maxval=0.1)
        boxes = jnp.concatenate([lowers_uppers, polys, poly2, cam_h, cam_p],
                                axis=-1).astype(jnp.float32)       # [B, Q, 14]
        return logits, boxes

    k_main, k_a0, k_a1, k_lab, k_rest, k_fl, k_h, k_p = jax.random.split(key, 8)
    main_logits, main_boxes = make_pred(k_main)
    a0_logits, a0_boxes = make_pred(k_a0)
    a1_logits, a1_boxes = make_pred(k_a1)

    labels = jax.random.randint(k_lab, (B, n_tgt, 1), 0, num_classes).astype(jnp.float32)
    tgt_rest = jax.random.uniform(k_rest, (B, n_tgt, T - 1), minval=0.1, maxval=1.0)
    targets = jnp.concatenate([labels, tgt_rest], axis=-1).astype(jnp.float32)   # [B, n_tgt, 69]

    flags = jnp.where(jax.random.uniform(k_fl, (B, n_tgt, S)) > 0.3, 1.0, -1.0)
    flags = flags.at[:, :, 0].set(1.0).astype(jnp.float32)          # >=1 valid point per box
    heights = jax.random.uniform(k_h, (B, n_tgt), minval=1.0, maxval=2.0).astype(jnp.float32)
    pitches = jax.random.uniform(k_p, (B, n_tgt), minval=-0.1, maxval=0.1).astype(jnp.float32)

    db = SimpleNamespace(gflatXnorm=2.0, gflatYnorm=5.0, gflatZnorm=0.3)
    criterion = SetCriterionPallas(
        num_classes=num_classes, matcher=simple_identity_matcher,
        weight_dict={'loss_ce': 1.0, 'loss_polys': 5.0},
        eos_coef=0.1, losses=['labels', 'cardinality', 'boxes'], seq_len=S, db=db)

    outputs = {
        'pred_logits': main_logits,
        'pred_boxes': main_boxes,
        'aux_outputs': [
            {'pred_logits': a0_logits, 'pred_boxes': a0_boxes},
            {'pred_logits': a1_logits, 'pred_boxes': a1_boxes},
        ],
    }

    losses, indices = criterion.forward(outputs, targets, flags, heights, pitches)
    losses = jax.block_until_ready(losses)
    print("KERNEL_OK")
</pallas_src>

<mosaic_0001>
module attributes {stable_mosaic.version = 11 : i64} {
  func.func @kernel(%arg0: i32, %arg1: memref<1x93x6xf32, #tpu.memory_space<vmem>>, %arg2: memref<1x8x128xf32, #tpu.memory_space<vmem>>) attributes {dimension_semantics = [#tpu.dimension_semantics<parallel>], iteration_bounds = array<i64: 3>, scalar_prefetch = 0 : i64, scratch_operands = 0 : i64, tpu.core_type = #tpu.core_type<tc>, window_params = [{transform_indices = @transform_0, window_bounds = array<i64: 1, 93, 6>}, {transform_indices = @transform_1, window_bounds = array<i64: 1, 8, 128>}]} {
    %c0 = arith.constant 0 : index
    %c2 = arith.constant 2 : index
    %c0_0 = arith.constant 0 : index
    %0 = vector.load %arg1[%c0, %c2, %c0_0] : memref<1x93x6xf32, #tpu.memory_space<vmem>>, vector<1x1x6xf32>
    %1 = vector.shape_cast %0 : vector<1x1x6xf32> to vector<1x6xf32>
    %c0_1 = arith.constant 0 : index
    %c3 = arith.constant 3 : index
    %c0_2 = arith.constant 0 : index
    %2 = vector.load %arg1[%c0_1, %c3, %c0_2] : memref<1x93x6xf32, #tpu.memory_space<vmem>>, vector<1x1x6xf32>
    %3 = vector.shape_cast %2 : vector<1x1x6xf32> to vector<1x6xf32>
    %c0_3 = arith.constant 0 : index
    %c4 = arith.constant 4 : index
    %c0_4 = arith.constant 0 : index
    %4 = vector.load %arg1[%c0_3, %c4, %c0_4] : memref<1x93x6xf32, #tpu.memory_space<vmem>>, vector<1x4x6xf32>
    %5 = vector.shape_cast %4 : vector<1x4x6xf32> to vector<4x6xf32>
    %c0_5 = arith.constant 0 : index
    %c8 = arith.constant 8 : index
    %c0_6 = arith.constant 0 : index
    %6 = vector.load %arg1[%c0_5, %c8, %c0_6] : memref<1x93x6xf32, #tpu.memory_space<vmem>>, vector<1x4x6xf32>
    %7 = vector.shape_cast %6 : vector<1x4x6xf32> to vector<4x6xf32>
    %c0_7 = arith.constant 0 : index
    %c12 = arith.constant 12 : index
    %c0_8 = arith.constant 0 : index
    %8 = vector.load %arg1[%c0_7, %c12, %c0_8] : memref<1x93x6xf32, #tpu.memory_space<vmem>>, vector<1x1x6xf32>
    %9 = vector.shape_cast %8 : vector<1x1x6xf32> to vector<1x6xf32>
    %c0_9 = arith.constant 0 : index
    %c13 = arith.constant 13 : index
    %c0_10 = arith.constant 0 : index
    %10 = vector.load %arg1[%c0_9, %c13, %c0_10] : memref<1x93x6xf32, #tpu.memory_space<vmem>>, vector<1x1x6xf32>
    %11 = vector.shape_cast %10 : vector<1x1x6xf32> to vector<1x6xf32>
    %c0_11 = arith.constant 0 : index
    %c17 = arith.constant 17 : index
    %c0_12 = arith.constant 0 : index
    %12 = vector.load %arg1[%c0_11, %c17, %c0_12] : memref<1x93x6xf32, #tpu.memory_space<vmem>>, vector<1x8x6xf32>
    %13 = vector.shape_cast %12 : vector<1x8x6xf32> to vector<8x6xf32>
    %c0_13 = arith.constant 0 : index
    %c25 = arith.constant 25 : index
    %c0_14 = arith.constant 0 : index
    %14 = vector.load %arg1[%c0_13, %c25, %c0_14] : memref<1x93x6xf32, #tpu.memory_space<vmem>>, vector<1x8x6xf32>
    %15 = vector.shape_cast %14 : vector<1x8x6xf32> to vector<8x6xf32>
    %c0_15 = arith.constant 0 : index
    %c33 = arith.constant 33 : index
    %c0_16 = arith.constant 0 : index
    %16 = vector.load %arg1[%c0_15, %c33, %c0_16] : memref<1x93x6xf32, #tpu.memory_space<vmem>>, vector<1x1x6xf32>
    %17 = vector.shape_cast %16 : vector<1x1x6xf32> to vector<1x6xf32>
    %c0_17 = arith.constant 0 : index
    %c34 = arith.constant 34 : index
    %c0_18 = arith.constant 0 : index
    %18 = vector.load %arg1[%c0_17, %c34, %c0_18] : memref<1x93x6xf32, #tpu.memory_space<vmem>>, vector<1x1x6xf32>
    %19 = vector.shape_cast %18 : vector<1x1x6xf32> to vector<1x6xf32>
    %c0_19 = arith.constant 0 : index
    %c35 = arith.constant 35 : index
    %c0_20 = arith.constant 0 : index
    %20 = vector.load %arg1[%c0_19, %c35, %c0_20] : memref<1x93x6xf32, #tpu.memory_space<vmem>>, vector<1x8x6xf32>
    %21 = vector.shape_cast %20 : vector<1x8x6xf32> to vector<8x6xf32>
    %c0_21 = arith.constant 0 : index
    %c43 = arith.constant 43 : index
    %c0_22 = arith.constant 0 : index
    %22 = vector.load %arg1[%c0_21, %c43, %c0_22] : memref<1x93x6xf32, #tpu.memory_space<vmem>>, vector<1x8x6xf32>
    %23 = vector.shape_cast %22 : vector<1x8x6xf32> to vector<8x6xf32>
    %c0_23 = arith.constant 0 : index
    %c51 = arith.constant 51 : index
    %c0_24 = arith.constant 0 : index
    %24 = vector.load %arg1[%c0_23, %c51, %c0_24] : memref<1x93x6xf32, #tpu.memory_space<vmem>>, vector<1x8x6xf32>
    %25 = vector.shape_cast %24 : vector<1x8x6xf32> to vector<8x6xf32>
    %c0_25 = arith.constant 0 : index
    %c59 = arith.constant 59 : index
    %c0_26 = arith.constant 0 : index
    %26 = vector.load %arg1[%c0_25, %c59, %c0_26] : memref<1x93x6xf32, #tpu.memory_space<vmem>>, vector<1x8x6xf32>
    %27 = vector.shape_cast %26 : vector<1x8x6xf32> to vector<8x6xf32>
    %c0_27 = arith.constant 0 : index
    %c67 = arith.constant 67 : index
    %c0_28 = arith.constant 0 : index
    %28 = vector.load %arg1[%c0_27, %c67, %c0_28] : memref<1x93x6xf32, #tpu.memory_space<vmem>>, vector<1x8x6xf32>
    %29 = vector.shape_cast %28 : vector<1x8x6xf32> to vector<8x6xf32>
    %c0_29 = arith.constant 0 : index
    %c83 = arith.constant 83 : index
    %c0_30 = arith.constant 0 : index
    %30 = vector.load %arg1[%c0_29, %c83, %c0_30] : memref<1x93x6xf32, #tpu.memory_space<vmem>>, vector<1x1x6xf32>
    %31 = vector.shape_cast %30 : vector<1x1x6xf32> to vector<1x6xf32>
    %c0_31 = arith.constant 0 : index
    %c84 = arith.constant 84 : index
    %c0_32 = arith.constant 0 : index
    %32 = vector.load %arg1[%c0_31, %c84, %c0_32] : memref<1x93x6xf32, #tpu.memory_space<vmem>>, vector<1x1x6xf32>
    %33 = vector.shape_cast %32 : vector<1x1x6xf32> to vector<1x6xf32>
    %c0_33 = arith.constant 0 : index
    %c85 = arith.constant 85 : index
    %c0_34 = arith.constant 0 : index
    %34 = vector.load %arg1[%c0_33, %c85, %c0_34] : memref<1x93x6xf32, #tpu.memory_space<vmem>>, vector<1x8x6xf32>
    %35 = vector.shape_cast %34 : vector<1x8x6xf32> to vector<8x6xf32>
    %cst = arith.constant 0.000000e+00 : f32
    %36 = vector.broadcast %cst : f32 to vector<8x6xf32>
    %37 = arith.cmpf ogt, %35, %36 : vector<8x6xf32>
    %38 = arith.extui %37 : vector<8x6xi1> to vector<8x6xi32>
    %39 = arith.sitofp %38 : vector<8x6xi32> to vector<8x6xf32>
    %cst_35 = arith.constant dense<0.000000e+00> : vector<6xf32>
    %40 = vector.multi_reduction <add>, %39, %cst_35 [0] : vector<8x6xf32> to vector<6xf32>
    %41 = vector.shape_cast %40 : vector<6xf32> to vector<1x6xf32>
    %cst_36 = arith.constant dense<0.000000e+00> : vector<1xf32>
    %42 = vector.multi_reduction <add>, %41, %cst_36 [1] : vector<1x6xf32> to vector<1xf32>
    %43 = vector.shape_cast %42 : vector<1xf32> to vector<1x1xf32>
    %44 = tpu.reciprocal %41 {approx = true} : vector<1x6xf32> -> vector<1x6xf32>
    %45 = vector.broadcast %43 : vector<1x1xf32> to vector<1x6xf32>
    %46 = arith.mulf %45, %44 : vector<1x6xf32>
    %47 = math.sqrt %46 : vector<1x6xf32>
    %cst_37 = arith.constant dense<0xFF800000> : vector<1xf32>
    %48 = vector.multi_reduction <maximumf>, %47, %cst_37 [1] : vector<1x6xf32> to vector<1xf32>
    %49 = vector.shape_cast %48 : vector<1xf32> to vector<1x1xf32>
    %50 = tpu.reciprocal %49 {approx = true} : vector<1x1xf32> -> vector<1x1xf32>
    %51 = vector.broadcast %50 : vector<1x1xf32> to vector<1x6xf32>
    %52 = arith.mulf %47, %51 : vector<1x6xf32>
    %53 = arith.mulf %23, %23 : vector<8x6xf32>
    %54 = arith.mulf %53, %23 : vector<8x6xf32>
    %55 = vector.extract_strided_slice %5 {offsets = [0, 0], sizes = [1, 6], strides = [1, 1]} : vector<4x6xf32> to vector<1x6xf32>
    %56 = vector.broadcast %55 : vector<1x6xf32> to vector<8x6xf32>
    %57 = arith.mulf %56, %54 : vector<8x6xf32>
    %58 = vector.extract_strided_slice %5 {offsets = [1, 0], sizes = [1, 6], strides = [1, 1]} : vector<4x6xf32> to vector<1x6xf32>
    %59 = vector.broadcast %58 : vector<1x6xf32> to vector<8x6xf32>
    %60 = arith.mulf %59, %53 : vector<8x6xf32>
    %61 = arith.addf %57, %60 : vector<8x6xf32>
    %62 = vector.extract_strided_slice %5 {offsets = [2, 0], sizes = [1, 6], strides = [1, 1]} : vector<4x6xf32> to vector<1x6xf32>
    %63 = vector.broadcast %62 : vector<1x6xf32> to vector<8x6xf32>
    %64 = arith.mulf %63, %23 : vector<8x6xf32>
    %65 = arith.addf %61, %64 : vector<8x6xf32>
    %66 = vector.extract_strided_slice %5 {offsets = [3, 0], sizes = [1, 6], strides = [1, 1]} : vector<4x6xf32> to vector<1x6xf32>
    %67 = vector.broadcast %66 : vector<1x6xf32> to vector<8x6xf32>
    %68 = arith.addf %65, %67 : vector<8x6xf32>
    %69 = vector.extract_strided_slice %7 {offsets = [0, 0], sizes = [1, 6], strides = [1, 1]} : vector<4x6xf32> to vector<1x6xf32>
    %70 = vector.broadcast %69 : vector<1x6xf32> to vector<8x6xf32>
    %71 = arith.mulf %70, %54 : vector<8x6xf32>
    %72 = vector.extract_strided_slice %7 {offsets = [1, 0], sizes = [1, 6], strides = [1, 1]} : vector<4x6xf32> to vector<1x6xf32>
    %73 = vector.broadcast %72 : vector<1x6xf32> to vector<8x6xf32>
    %74 = arith.mulf %73, %53 : vector<8x6xf32>
    %75 = arith.addf %71, %74 : vector<8x6xf32>
    %76 = vector.extract_strided_slice %7 {offsets = [2, 0], sizes = [1, 6], strides = [1, 1]} : vector<4x6xf32> to vector<1x6xf32>
    %77 = vector.broadcast %76 : vector<1x6xf32> to vector<8x6xf32>
    %78 = arith.mulf %77, %23 : vector<8x6xf32>
    %79 = arith.addf %75, %78 : vector<8x6xf32>
    %80 = vector.extract_strided_slice %7 {offsets = [3, 0], sizes = [1, 6], strides = [1, 1]} : vector<4x6xf32> to vector<1x6xf32>
    %81 = vector.broadcast %80 : vector<1x6xf32> to vector<8x6xf32>
    %82 = arith.addf %79, %81 : vector<8x6xf32>
    %cst_38 = arith.constant 3.000000e-01 : f32
    %83 = vector.broadcast %cst_38 : f32 to vector<8x6xf32>
    %84 = arith.mulf %82, %83 : vector<8x6xf32>
    %85 = vector.broadcast %9 : vector<1x6xf32> to vector<8x6xf32>
    %86 = arith.subf %85, %84 : vector<8x6xf32>
    %87 = tpu.reciprocal %86 {approx = true} : vector<8x6xf32> -> vector<8x6xf32>
    %cst_39 = arith.constant 2.000000e+00 : f32
    %88 = vector.broadcast %cst_39 : f32 to vector<1x6xf32>
    %89 = arith.mulf %88, %9 : vector<1x6xf32>
    %90 = vector.broadcast %89 : vector<1x6xf32> to vector<8x6xf32>
    %91 = arith.mulf %68, %90 : vector<8x6xf32>
    %92 = arith.mulf %91, %87 : vector<8x6xf32>
    %cst_40 = arith.constant 5.000000e+00 : f32
    %93 = vector.broadcast %cst_40 : f32 to vector<1x6xf32>
    %94 = arith.mulf %93, %9 : vector<1x6xf32>
    %95 = vector.broadcast %94 : vector<1x6xf32> to vector<8x6xf32>
    %96 = arith.mulf %23, %95 : vector<8x6xf32>
    %97 = arith.mulf %96, %87 : vector<8x6xf32>
    %98 = math.cos %11 : vector<1x6xf32>
    %99 = math.sin %11 : vector<1x6xf32>
    %100 = vector.broadcast %98 : vector<1x6xf32> to vector<8x6xf32>
    %101 = arith.mulf %100, %97 : vector<8x6xf32>
    %102 = tpu.reciprocal %101 {approx = true} : vector<8x6xf32> -> vector<8x6xf32>
    %cst_41 = arith.constant 2.015000e+03 : f32
    %103 = vector.broadcast %cst_41 : f32 to vector<8x6xf32>
    %104 = arith.mulf %103, %92 : vector<8x6xf32>
    %cst_42 = arith.constant 9.600000e+02 : f32
    %105 = vector.broadcast %cst_42 : f32 to vector<1x6xf32>
    %106 = arith.mulf %105, %98 : vector<1x6xf32>
    %107 = vector.broadcast %106 : vector<1x6xf32> to vector<8x6xf32>
    %108 = arith.mulf %107, %97 : vector<8x6xf32>
    %109 = arith.addf %104, %108 : vector<8x6xf32>
    %110 = arith.mulf %109, %102 : vector<8x6xf32>
    %cst_43 = arith.constant 0.000000e+00 : f32
    %111 = vector.broadcast %cst_43 : f32 to vector<1x6xf32>
    %112 = arith.subf %111, %99 : vector<1x6xf32>
    %cst_44 = arith.constant 2.015000e+03 : f32
    %113 = vector.broadcast %cst_44 : f32 to vector<1x6xf32>
    %114 = arith.mulf %113, %112 : vector<1x6xf32>
    %cst_45 = arith.constant 5.400000e+02 : f32
    %115 = vector.broadcast %cst_45 : f32 to vector<1x6xf32>
    %116 = arith.mulf %115, %98 : vector<1x6xf32>
    %117 = arith.addf %114, %116 : vector<1x6xf32>
    %118 = vector.broadcast %117 : vector<1x6xf32> to vector<8x6xf32>
    %119 = arith.mulf %118, %97 : vector<8x6xf32>
    %cst_46 = arith.constant 2.015000e+03 : f32
    %120 = vector.broadcast %cst_46 : f32 to vector<1x6xf32>
    %121 = arith.mulf %120, %9 : vector<1x6xf32>
    %122 = vector.broadcast %121 : vector<1x6xf32> to vector<8x6xf32>
    %123 = arith.addf %119, %122 : vector<8x6xf32>
    %124 = arith.mulf %123, %102 : vector<8x6xf32>
    %125 = arith.subf %68, %21 : vector<8x6xf32>
    %126 = math.absf %125 : vector<8x6xf32>
    %127 = vector.broadcast %52 : vector<1x6xf32> to vector<8x6xf32>
    %128 = arith.mulf %126, %127 : vector<8x6xf32>
    %cst_47 = arith.constant 0.000000e+00 : f32
    %129 = vector.broadcast %cst_47 : f32 to vector<8x6xf32>
    %130 = arith.select %37, %128, %129 : vector<8x6xi1>, vector<8x6xf32>
    %cst_48 = arith.constant dense<0.000000e+00> : vector<8xf32>
    %131 = vector.multi_reduction <add>, %130, %cst_48 [1] : vector<8x6xf32> to vector<8xf32>
    %132 = vector.shape_cast %131 : vector<8xf32> to vector<8x1xf32>
    %cst_49 = arith.constant dense<0.000000e+00> : vector<1xf32>
    %133 = vector.multi_reduction <add>, %132, %cst_49 [0] : vector<8x1xf32> to vector<1xf32>
    %134 = vector.shape_cast %133 : vector<1xf32> to vector<1x1xf32>
    %cst_50 = arith.constant 0.166666672 : f32
    %135 = vector.broadcast %cst_50 : f32 to vector<1x1xf32>
    %136 = arith.mulf %134, %135 : vector<1x1xf32>
    %137 = arith.subf %82, %25 : vector<8x6xf32>
    %138 = math.absf %137 : vector<8x6xf32>
    %139 = vector.broadcast %52 : vector<1x6xf32> to vector<8x6xf32>
    %140 = arith.mulf %138, %139 : vector<8x6xf32>
    %cst_51 = arith.constant 0.000000e+00 : f32
    %141 = vector.broadcast %cst_51 : f32 to vector<8x6xf32>
    %142 = arith.select %37, %140, %141 : vector<8x6xi1>, vector<8x6xf32>
    %cst_52 = arith.constant dense<0.000000e+00> : vector<8xf32>
    %143 = vector.multi_reduction <add>, %142, %cst_52 [1] : vector<8x6xf32> to vector<8xf32>
    %144 = vector.shape_cast %143 : vector<8xf32> to vector<8x1xf32>
    %cst_53 = arith.constant dense<0.000000e+00> : vector<1xf32>
    %145 = vector.multi_reduction <add>, %144, %cst_53 [0] : vector<8x1xf32> to vector<1xf32>
    %146 = vector.shape_cast %145 : vector<1xf32> to vector<1x1xf32>
    %cst_54 = arith.constant 0.166666672 : f32
    %147 = vector.broadcast %cst_54 : f32 to vector<1x1xf32>
    %148 = arith.mulf %146, %147 : vector<1x1xf32>
    %149 = arith.subf %1, %17 : vector<1x6xf32>
    %150 = math.absf %149 : vector<1x6xf32>
    %cst_55 = arith.constant dense<0.000000e+00> : vector<1xf32>
    %151 = vector.multi_reduction <add>, %150, %cst_55 [1] : vector<1x6xf32> to vector<1xf32>
    %152 = vector.shape_cast %151 : vector<1xf32> to vector<1x1xf32>
    %cst_56 = arith.constant dense<0.000000e+00> : vector<1xf32>
    %153 = vector.multi_reduction <add>, %152, %cst_56 [0] : vector<1x1xf32> to vector<1xf32>
    %154 = vector.shape_cast %153 : vector<1xf32> to vector<1x1xf32>
    %cst_57 = arith.constant 0.166666672 : f32
    %155 = vector.broadcast %cst_57 : f32 to vector<1x1xf32>
    %156 = arith.mulf %154, %155 : vector<1x1xf32>
    %157 = arith.subf %3, %19 : vector<1x6xf32>
    %158 = math.absf %157 : vector<1x6xf32>
    %cst_58 = arith.constant dense<0.000000e+00> : vector<1xf32>
    %159 = vector.multi_reduction <add>, %158, %cst_58 [1] : vector<1x6xf32> to vector<1xf32>
    %160 = vector.shape_cast %159 : vector<1xf32> to vector<1x1xf32>
    %cst_59 = arith.constant dense<0.000000e+00> : vector<1xf32>
    %161 = vector.multi_reduction <add>, %160, %cst_59 [0] : vector<1x1xf32> to vector<1xf32>
    %162 = vector.shape_cast %161 : vector<1xf32> to vector<1x1xf32>
    %cst_60 = arith.constant 0.166666672 : f32
    %163 = vector.broadcast %cst_60 : f32 to vector<1x1xf32>
    %164 = arith.mulf %162, %163 : vector<1x1xf32>
    %cst_61 = arith.constant 5.000000e-01 : f32
    %165 = vector.broadcast %cst_61 : f32 to vector<8x6xf32>
    %166 = arith.mulf %92, %165 : vector<8x6xf32>
    %167 = arith.subf %166, %27 : vector<8x6xf32>
    %168 = math.absf %167 : vector<8x6xf32>
    %169 = vector.broadcast %52 : vector<1x6xf32> to vector<8x6xf32>
    %170 = arith.mulf %168, %169 : vector<8x6xf32>
    %cst_62 = arith.constant 0.000000e+00 : f32
    %171 = vector.broadcast %cst_62 : f32 to vector<8x6xf32>
    %172 = arith.select %37, %170, %171 : vector<8x6xi1>, vector<8x6xf32>
    %cst_63 = arith.constant dense<0.000000e+00> : vector<8xf32>
    %173 = vector.multi_reduction <add>, %172, %cst_63 [1] : vector<8x6xf32> to vector<8xf32>
    %174 = vector.shape_cast %173 : vector<8xf32> to vector<8x1xf32>
    %cst_64 = arith.constant dense<0.000000e+00> : vector<1xf32>
    %175 = vector.multi_reduction <add>, %174, %cst_64 [0] : vector<8x1xf32> to vector<1xf32>
    %176 = vector.shape_cast %175 : vector<1xf32> to vector<1x1xf32>
    %cst_65 = arith.constant 0.166666672 : f32
    %177 = vector.broadcast %cst_65 : f32 to vector<1x1xf32>
    %178 = arith.mulf %176, %177 : vector<1x1xf32>
    %cst_66 = arith.constant 2.000000e-01 : f32
    %179 = vector.broadcast %cst_66 : f32 to vector<8x6xf32>
    %180 = arith.mulf %97, %179 : vector<8x6xf32>
    %181 = arith.subf %180, %29 : vector<8x6xf32>
    %182 = math.absf %181 : vector<8x6xf32>
    %183 = vector.broadcast %52 : vector<1x6xf32> to vector<8x6xf32>
    %184 = arith.mulf %182, %183 : vector<8x6xf32>
    %cst_67 = arith.constant 0.000000e+00 : f32
    %185 = vector.broadcast %cst_67 : f32 to vector<8x6xf32>
    %186 = arith.select %37, %184, %185 : vector<8x6xi1>, vector<8x6xf32>
    %cst_68 = arith.constant dense<0.000000e+00> : vector<8xf32>
    %187 = vector.multi_reduction <add>, %186, %cst_68 [1] : vector<8x6xf32> to vector<8xf32>
    %188 = vector.shape_cast %187 : vector<8xf32> to vector<8x1xf32>
    %cst_69 = arith.constant dense<0.000000e+00> : vector<1xf32>
    %189 = vector.multi_reduction <add>, %188, %cst_69 [0] : vector<8x1xf32> to vector<1xf32>
    %190 = vector.shape_cast %189 : vector<1xf32> to vector<1x1xf32>
    %cst_70 = arith.constant 0.166666672 : f32
    %191 = vector.broadcast %cst_70 : f32 to vector<1x1xf32>
    %192 = arith.mulf %190, %191 : vector<1x1xf32>
    %cst_71 = arith.constant 5.2083336E-4 : f32
    %193 = vector.broadcast %cst_71 : f32 to vector<8x6xf32>
    %194 = arith.mulf %110, %193 : vector<8x6xf32>
    %195 = arith.subf %194, %13 : vector<8x6xf32>
    %196 = math.absf %195 : vector<8x6xf32>
    %197 = vector.broadcast %52 : vector<1x6xf32> to vector<8x6xf32>
    %198 = arith.mulf %196, %197 : vector<8x6xf32>
    %cst_72 = arith.constant 0.000000e+00 : f32
    %199 = vector.broadcast %cst_72 : f32 to vector<8x6xf32>
    %200 = arith.select %37, %198, %199 : vector<8x6xi1>, vector<8x6xf32>
    %cst_73 = arith.constant dense<0.000000e+00> : vector<8xf32>
    %201 = vector.multi_reduction <add>, %200, %cst_73 [1] : vector<8x6xf32> to vector<8xf32>
    %202 = vector.shape_cast %201 : vector<8xf32> to vector<8x1xf32>
    %cst_74 = arith.constant dense<0.000000e+00> : vector<1xf32>
    %203 = vector.multi_reduction <add>, %202, %cst_74 [0] : vector<8x1xf32> to vector<1xf32>
    %204 = vector.shape_cast %203 : vector<1xf32> to vector<1x1xf32>
    %cst_75 = arith.constant 0.166666672 : f32
    %205 = vector.broadcast %cst_75 : f32 to vector<1x1xf32>
    %206 = arith.mulf %204, %205 : vector<1x1xf32>
    %cst_76 = arith.constant 9.25925909E-4 : f32
    %207 = vector.broadcast %cst_76 : f32 to vector<8x6xf32>
    %208 = arith.mulf %124, %207 : vector<8x6xf32>
    %209 = arith.subf %208, %15 : vector<8x6xf32>
    %210 = math.absf %209 : vector<8x6xf32>
    %211 = vector.broadcast %52 : vector<1x6xf32> to vector<8x6xf32>
    %212 = arith.mulf %210, %211 : vector<8x6xf32>
    %cst_77 = arith.constant 0.000000e+00 : f32
    %213 = vector.broadcast %cst_77 : f32 to vector<8x6xf32>
    %214 = arith.select %37, %212, %213 : vector<8x6xi1>, vector<8x6xf32>
    %cst_78 = arith.constant dense<0.000000e+00> : vector<8xf32>
    %215 = vector.multi_reduction <add>, %214, %cst_78 [1] : vector<8x6xf32> to vector<8xf32>
    %216 = vector.shape_cast %215 : vector<8xf32> to vector<8x1xf32>
    %cst_79 = arith.constant dense<0.000000e+00> : vector<1xf32>
    %217 = vector.multi_reduction <add>, %216, %cst_79 [0] : vector<8x1xf32> to vector<1xf32>
    %218 = vector.shape_cast %217 : vector<1xf32> to vector<1x1xf32>
    %cst_80 = arith.constant 0.166666672 : f32
    %219 = vector.broadcast %cst_80 : f32 to vector<1x1xf32>
    %220 = arith.mulf %218, %219 : vector<1x1xf32>
    %221 = arith.subf %9, %31 : vector<1x6xf32>
    %222 = math.absf %221 : vector<1x6xf32>
    %cst_81 = arith.constant dense<0.000000e+00> : vector<1xf32>
    %223 = vector.multi_reduction <add>, %222, %cst_81 [1] : vector<1x6xf32> to vector<1xf32>
    %224 = vector.shape_cast %223 : vector<1xf32> to vector<1x1xf32>
    %cst_82 = arith.constant dense<0.000000e+00> : vector<1xf32>
    %225 = vector.multi_reduction <add>, %224, %cst_82 [0] : vector<1x1xf32> to vector<1xf32>
    %226 = vector.shape_cast %225 : vector<1xf32> to vector<1x1xf32>
    %cst_83 = arith.constant 0.166666672 : f32
    %227 = vector.broadcast %cst_83 : f32 to vector<1x1xf32>
    %228 = arith.mulf %226, %227 : vector<1x1xf32>
    %229 = arith.subf %11, %33 : vector<1x6xf32>
    %230 = math.absf %229 : vector<1x6xf32>
    %cst_84 = arith.constant dense<0.000000e+00> : vector<1xf32>
    %231 = vector.multi_reduction <add>, %230, %cst_84 [1] : vector<1x6xf32> to vector<1xf32>
    %232 = vector.shape_cast %231 : vector<1xf32> to vector<1x1xf32>
    %cst_85 = arith.constant dense<0.000000e+00> : vector<1xf32>
    %233 = vector.multi_reduction <add>, %232, %cst_85 [0] : vector<1x1xf32> to vector<1xf32>
    %234 = vector.shape_cast %233 : vector<1xf32> to vector<1x1xf32>
    %cst_86 = arith.constant 0.166666672 : f32
    %235 = vector.broadcast %cst_86 : f32 to vector<1x1xf32>
    %236 = arith.mulf %234, %235 : vector<1x1xf32>
    %237 = tpu.iota {dimensions = array<i32: 1>} : vector<1x128xi32>
    %cst_87 = arith.constant 0.000000e+00 : f32
    %238 = vector.broadcast %cst_87 : f32 to vector<1x128xf32>
    %c0_i32 = arith.constant 0 : i32
    %239 = vector.broadcast %c0_i32 : i32 to vector<1x128xi32>
    %240 = arith.cmpi eq, %237, %239 : vector<1x128xi32>
    %cst_88 = arith.constant 0.000000e+00 : f32
    %241 = vector.shape_cast %136 : vector<1x1xf32> to vector<1x1xf32>
    %242 = vector.broadcast %241 : vector<1x1xf32> to vector<1x128xf32>
    %243 = vector.broadcast %cst_88 : f32 to vector<1x128xf32>
    %244 = arith.select %240, %242, %243 : vector<1x128xi1>, vector<1x128xf32>
    %245 = arith.addf %238, %244 : vector<1x128xf32>
    %c1_i32 = arith.constant 1 : i32
    %246 = vector.broadcast %c1_i32 : i32 to vector<1x128xi32>
    %247 = arith.cmpi eq, %237, %246 : vector<1x128xi32>
    %cst_89 = arith.constant 0.000000e+00 : f32
    %248 = vector.shape_cast %148 : vector<1x1xf32> to vector<1x1xf32>
    %249 = vector.broadcast %248 : vector<1x1xf32> to vector<1x128xf32>
    %250 = vector.broadcast %cst_89 : f32 to vector<1x128xf32>
    %251 = arith.select %247, %249, %250 : vector<1x128xi1>, vector<1x128xf32>
    %252 = arith.addf %245, %251 : vector<1x128xf32>
    %c2_i32 = arith.constant 2 : i32
    %253 = vector.broadcast %c2_i32 : i32 to vector<1x128xi32>
    %254 = arith.cmpi eq, %237, %253 : vector<1x128xi32>
    %cst_90 = arith.constant 0.000000e+00 : f32
    %255 = vector.shape_cast %156 : vector<1x1xf32> to vector<1x1xf32>
    %256 = vector.broadcast %255 : vector<1x1xf32> to vector<1x128xf32>
    %257 = vector.broadcast %cst_90 : f32 to vector<1x128xf32>
    %258 = arith.select %254, %256, %257 : vector<1x128xi1>, vector<1x128xf32>
    %259 = arith.addf %252, %258 : vector<1x128xf32>
    %c3_i32 = arith.constant 3 : i32
    %260 = vector.broadcast %c3_i32 : i32 to vector<1x128xi32>
    %261 = arith.cmpi eq, %237, %260 : vector<1x128xi32>
    %cst_91 = arith.constant 0.000000e+00 : f32
    %262 = vector.shape_cast %164 : vector<1x1xf32> to vector<1x1xf32>
    %263 = vector.broadcast %262 : vector<1x1xf32> to vector<1x128xf32>
    %264 = vector.broadcast %cst_91 : f32 to vector<1x128xf32>
    %265 = arith.select %261, %263, %264 : vector<1x128xi1>, vector<1x128xf32>
    %266 = arith.addf %259, %265 : vector<1x128xf32>
    %c4_i32 = arith.constant 4 : i32
    %267 = vector.broadcast %c4_i32 : i32 to vector<1x128xi32>
    %268 = arith.cmpi eq, %237, %267 : vector<1x128xi32>
    %cst_92 = arith.constant 0.000000e+00 : f32
    %269 = vector.shape_cast %178 : vector<1x1xf32> to vector<1x1xf32>
    %270 = vector.broadcast %269 : vector<1x1xf32> to vector<1x128xf32>
    %271 = vector.broadcast %cst_92 : f32 to vector<1x128xf32>
    %272 = arith.select %268, %270, %271 : vector<1x128xi1>, vector<1x128xf32>
    %273 = arith.addf %266, %272 : vector<1x128xf32>
    %c5_i32 = arith.constant 5 : i32
    %274 = vector.broadcast %c5_i32 : i32 to vector<1x128xi32>
    %275 = arith.cmpi eq, %237, %274 : vector<1x128xi32>
    %cst_93 = arith.constant 0.000000e+00 : f32
    %276 = vector.shape_cast %192 : vector<1x1xf32> to vector<1x1xf32>
    %277 = vector.broadcast %276 : vector<1x1xf32> to vector<1x128xf32>
    %278 = vector.broadcast %cst_93 : f32 to vector<1x128xf32>
    %279 = arith.select %275, %277, %278 : vector<1x128xi1>, vector<1x128xf32>
    %280 = arith.addf %273, %279 : vector<1x128xf32>
    %c6_i32 = arith.constant 6 : i32
    %281 = vector.broadcast %c6_i32 : i32 to vector<1x128xi32>
    %282 = arith.cmpi eq, %237, %281 : vector<1x128xi32>
    %cst_94 = arith.constant 0.000000e+00 : f32
    %283 = vector.shape_cast %206 : vector<1x1xf32> to vector<1x1xf32>
    %284 = vector.broadcast %283 : vector<1x1xf32> to vector<1x128xf32>
    %285 = vector.broadcast %cst_94 : f32 to vector<1x128xf32>
    %286 = arith.select %282, %284, %285 : vector<1x128xi1>, vector<1x128xf32>
    %287 = arith.addf %280, %286 : vector<1x128xf32>
    %c7_i32 = arith.constant 7 : i32
    %288 = vector.broadcast %c7_i32 : i32 to vector<1x128xi32>
    %289 = arith.cmpi eq, %237, %288 : vector<1x128xi32>
    %cst_95 = arith.constant 0.000000e+00 : f32
    %290 = vector.shape_cast %220 : vector<1x1xf32> to vector<1x1xf32>
    %291 = vector.broadcast %290 : vector<1x1xf32> to vector<1x128xf32>
    %292 = vector.broadcast %cst_95 : f32 to vector<1x128xf32>
    %293 = arith.select %289, %291, %292 : vector<1x128xi1>, vector<1x128xf32>
    %294 = arith.addf %287, %293 : vector<1x128xf32>
    %c8_i32 = arith.constant 8 : i32
    %295 = vector.broadcast %c8_i32 : i32 to vector<1x128xi32>
    %296 = arith.cmpi eq, %237, %295 : vector<1x128xi32>
    %cst_96 = arith.constant 0.000000e+00 : f32
    %297 = vector.shape_cast %228 : vector<1x1xf32> to vector<1x1xf32>
    %298 = vector.broadcast %297 : vector<1x1xf32> to vector<1x128xf32>
    %299 = vector.broadcast %cst_96 : f32 to vector<1x128xf32>
    %300 = arith.select %296, %298, %299 : vector<1x128xi1>, vector<1x128xf32>
    %301 = arith.addf %294, %300 : vector<1x128xf32>
    %c9_i32 = arith.constant 9 : i32
    %302 = vector.broadcast %c9_i32 : i32 to vector<1x128xi32>
    %303 = arith.cmpi eq, %237, %302 : vector<1x128xi32>
    %cst_97 = arith.constant 0.000000e+00 : f32
    %304 = vector.shape_cast %236 : vector<1x1xf32> to vector<1x1xf32>
    %305 = vector.broadcast %304 : vector<1x1xf32> to vector<1x128xf32>
    %306 = vector.broadcast %cst_97 : f32 to vector<1x128xf32>
    %307 = arith.select %303, %305, %306 : vector<1x128xi1>, vector<1x128xf32>
    %308 = arith.addf %301, %307 : vector<1x128xf32>
    %309 = vector.shape_cast %308 : vector<1x128xf32> to vector<1x1x128xf32>
    %310 = vector.broadcast %309 : vector<1x1x128xf32> to vector<1x8x128xf32>
    %c0_98 = arith.constant 0 : index
    %c0_99 = arith.constant 0 : index
    %c0_100 = arith.constant 0 : index
    %311 = vector.load %arg2[%c0_98, %c0_99, %c0_100] : memref<1x8x128xf32, #tpu.memory_space<vmem>>, vector<1x8x128xf32>
    tpu.vector_store %arg2[%c0_98, %c0_99, %c0_100], %310 {strides = array<i32>} : memref<1x8x128xf32, #tpu.memory_space<vmem>>, vector<1x8x128xf32>,
    return
  }
  func.func @transform_0(%arg0: i32) -> (i32, i32, i32) {
    %c0_i32 = arith.constant 0 : i32
    %c0_i32_0 = arith.constant 0 : i32
    %c0_i32_1 = arith.constant 0 : i32
    return %arg0, %c0_i32, %c0_i32_0 : i32, i32, i32
  }
  func.func @transform_1(%arg0: i32) -> (i32, i32, i32) {
    %c0_i32 = arith.constant 0 : i32
    %c0_i32_0 = arith.constant 0 : i32
    %c0_i32_1 = arith.constant 0 : i32
    return %arg0, %c0_i32, %c0_i32_0 : i32, i32, i32
  }
}

module attributes {stable_mosaic.version = 11 : i64} {
  func.func @kernel(%arg0: i32, %arg1: memref<1x2x8x4xf32, #tpu.memory_space<vmem>>, %arg2: memref<1x2x8x1xi32, #tpu.memory_space<vmem>>, %arg3: memref<1x2x8x1xf32, #tpu.memory_space<vmem>>, %arg4: memref<1x8x128xf32, #tpu.memory_space<vmem>>) attributes {dimension_semantics = [#tpu.dimension_semantics<parallel>], iteration_bounds = array<i64: 3>, scalar_prefetch = 0 : i64, scratch_operands = 0 : i64, tpu.core_type = #tpu.core_type<tc>, window_params = [{transform_indices = @transform_0, window_bounds = array<i64: 1, 2, 8, 4>}, {transform_indices = @transform_1, window_bounds = array<i64: 1, 2, 8, 1>}, {transform_indices = @transform_2, window_bounds = array<i64: 1, 2, 8, 1>}, {transform_indices = @transform_3, window_bounds = array<i64: 1, 8, 128>}]} {
    %c0 = arith.constant 0 : index
    %c0_0 = arith.constant 0 : index
    %c0_1 = arith.constant 0 : index
    %c0_2 = arith.constant 0 : index
    %0 = vector.load %arg1[%c0, %c0_0, %c0_1, %c0_2] : memref<1x2x8x4xf32, #tpu.memory_space<vmem>>, vector<1x2x8x4xf32>
    %1 = vector.shape_cast %0 : vector<1x2x8x4xf32> to vector<2x8x4xf32>
    %c0_3 = arith.constant 0 : index
    %c0_4 = arith.constant 0 : index
    %c0_5 = arith.constant 0 : index
    %c0_6 = arith.constant 0 : index
    %2 = vector.load %arg2[%c0_3, %c0_4, %c0_5, %c0_6] : memref<1x2x8x1xi32, #tpu.memory_space<vmem>>, vector<1x2x8x1xi32>
    %3 = vector.shape_cast %2 : vector<1x2x8x1xi32> to vector<2x8x1xi32>
    %c0_7 = arith.constant 0 : index
    %c0_8 = arith.constant 0 : index
    %c0_9 = arith.constant 0 : index
    %c0_10 = arith.constant 0 : index
    %4 = vector.load %arg3[%c0_7, %c0_8, %c0_9, %c0_10] : memref<1x2x8x1xf32, #tpu.memory_space<vmem>>, vector<1x2x8x1xf32>
    %5 = vector.shape_cast %4 : vector<1x2x8x1xf32> to vector<2x8x1xf32>
    %6 = tpu.iota {dimensions = array<i32: 2>} : vector<2x8x4xi32>
    %7 = vector.broadcast %3 : vector<2x8x1xi32> to vector<2x8x4xi32>
    %8 = arith.cmpi eq, %6, %7 : vector<2x8x4xi32>
    %9 = arith.extui %8 : vector<2x8x4xi1> to vector<2x8x4xi32>
    %10 = arith.sitofp %9 : vector<2x8x4xi32> to vector<2x8x4xf32>
    %cst = arith.constant dense<0xFF800000> : vector<2x8xf32>
    %11 = vector.multi_reduction <maximumf>, %1, %cst [2] : vector<2x8x4xf32> to vector<2x8xf32>
    %12 = vector.shape_cast %11 : vector<2x8xf32> to vector<2x8x1xf32>
    %13 = vector.broadcast %12 : vector<2x8x1xf32> to vector<2x8x4xf32>
    %14 = arith.subf %1, %13 : vector<2x8x4xf32>
    %15 = math.exp %14 : vector<2x8x4xf32>
    %cst_11 = arith.constant dense<0.000000e+00> : vector<2x8xf32>
    %16 = vector.multi_reduction <add>, %15, %cst_11 [2] : vector<2x8x4xf32> to vector<2x8xf32>
    %17 = vector.shape_cast %16 : vector<2x8xf32> to vector<2x8x1xf32>
    %18 = math.log %17 : vector<2x8x1xf32>
    %19 = arith.addf %12, %18 : vector<2x8x1xf32>
    %20 = arith.mulf %10, %1 : vector<2x8x4xf32>
    %cst_12 = arith.constant dense<0.000000e+00> : vector<2x8xf32>
    %21 = vector.multi_reduction <add>, %20, %cst_12 [2] : vector<2x8x4xf32> to vector<2x8xf32>
    %22 = vector.shape_cast %21 : vector<2x8xf32> to vector<2x8x1xf32>
    %c3_i32 = arith.constant 3 : i32
    %23 = vector.broadcast %c3_i32 : i32 to vector<2x8x1xi32>
    %24 = arith.cmpi eq, %3, %23 : vector<2x8x1xi32>
    %cst_13 = arith.constant 1.000000e-01 : f32
    %cst_14 = arith.constant 1.000000e+00 : f32
    %25 = vector.broadcast %cst_13 : f32 to vector<2x8x1xf32>
    %26 = vector.broadcast %cst_14 : f32 to vector<2x8x1xf32>
    %27 = arith.select %24, %25, %26 : vector<2x8x1xi1>, vector<2x8x1xf32>
    %28 = arith.subf %19, %22 : vector<2x8x1xf32>
    %29 = vector.broadcast %12 : vector<2x8x1xf32> to vector<2x8x4xf32>
    %30 = arith.cmpf oeq, %1, %29 : vector<2x8x4xf32>
    %31 = arith.sitofp %6 : vector<2x8x4xi32> to vector<2x8x4xf32>
    %cst_15 = arith.constant 4.000000e+00 : f32
    %32 = vector.broadcast %cst_15 : f32 to vector<2x8x4xf32>
    %33 = arith.select %30, %31, %32 : vector<2x8x4xi1>, vector<2x8x4xf32>
    %cst_16 = arith.constant dense<0x7F800000> : vector<2x8xf32>
    %34 = vector.multi_reduction <minimumf>, %33, %cst_16 [2] : vector<2x8x4xf32> to vector<2x8xf32>
    %35 = vector.shape_cast %34 : vector<2x8xf32> to vector<2x8x1xf32>
    %cst_17 = arith.constant 3.000000e+00 : f32
    %36 = vector.broadcast %cst_17 : f32 to vector<2x8x1xf32>
    %37 = arith.cmpf one, %35, %36 : vector<2x8x1xf32>
    %38 = arith.extui %37 : vector<2x8x1xi1> to vector<2x8x1xi32>
    %39 = arith.sitofp %38 : vector<2x8x1xi32> to vector<2x8x1xf32>
    %40 = arith.sitofp %3 : vector<2x8x1xi32> to vector<2x8x1xf32>
    %41 = arith.cmpf oeq, %35, %40 : vector<2x8x1xf32>
    %42 = arith.extui %41 : vector<2x8x1xi1> to vector<2x8x1xi32>
    %43 = arith.sitofp %42 : vector<2x8x1xi32> to vector<2x8x1xf32>
    %44 = arith.mulf %5, %43 : vector<2x8x1xf32>
    %45 = arith.mulf %27, %28 : vector<2x8x1xf32>
    %cst_18 = arith.constant dense<0.000000e+00> : vector<2x1xf32>
    %46 = vector.multi_reduction <add>, %45, %cst_18 [1] : vector<2x8x1xf32> to vector<2x1xf32>
    %47 = vector.shape_cast %46 : vector<2x1xf32> to vector<2x1x1xf32>
    %cst_19 = arith.constant dense<0.000000e+00> : vector<1x1xf32>
    %48 = vector.multi_reduction <add>, %47, %cst_19 [0] : vector<2x1x1xf32> to vector<1x1xf32>
    %cst_20 = arith.constant dense<0.000000e+00> : vector<2x1xf32>
    %49 = vector.multi_reduction <add>, %27, %cst_20 [1] : vector<2x8x1xf32> to vector<2x1xf32>
    %50 = vector.shape_cast %49 : vector<2x1xf32> to vector<2x1x1xf32>
    %cst_21 = arith.constant dense<0.000000e+00> : vector<1x1xf32>
    %51 = vector.multi_reduction <add>, %50, %cst_21 [0] : vector<2x1x1xf32> to vector<1x1xf32>
    %cst_22 = arith.constant dense<0.000000e+00> : vector<2x1xf32>
    %52 = vector.multi_reduction <add>, %39, %cst_22 [1] : vector<2x8x1xf32> to vector<2x1xf32>
    %53 = vector.shape_cast %52 : vector<2x1xf32> to vector<2x1x1xf32>
    %cst_23 = arith.constant 3.000000e+00 : f32
    %54 = vector.broadcast %cst_23 : f32 to vector<2x1x1xf32>
    %55 = arith.subf %53, %54 : vector<2x1x1xf32>
    %56 = math.absf %55 : vector<2x1x1xf32>
    %cst_24 = arith.constant dense<0.000000e+00> : vector<1x1xf32>
    %57 = vector.multi_reduction <add>, %56, %cst_24 [0] : vector<2x1x1xf32> to vector<1x1xf32>
    %cst_25 = arith.constant 5.000000e-01 : f32
    %58 = vector.broadcast %cst_25 : f32 to vector<1x1xf32>
    %59 = arith.mulf %57, %58 : vector<1x1xf32>
    %cst_26 = arith.constant dense<0.000000e+00> : vector<2x1xf32>
    %60 = vector.multi_reduction <add>, %44, %cst_26 [1] : vector<2x8x1xf32> to vector<2x1xf32>
    %61 = vector.shape_cast %60 : vector<2x1xf32> to vector<2x1x1xf32>
    %cst_27 = arith.constant dense<0.000000e+00> : vector<1x1xf32>
    %62 = vector.multi_reduction <add>, %61, %cst_27 [0] : vector<2x1x1xf32> to vector<1x1xf32>
    %63 = arith.divf %48, %51 : vector<1x1xf32>
    %cst_28 = arith.constant 16.666666 : f32
    %64 = vector.broadcast %cst_28 : f32 to vector<1x1xf32>
    %65 = arith.mulf %62, %64 : vector<1x1xf32>
    %cst_29 = arith.constant 1.000000e+02 : f32
    %66 = vector.broadcast %cst_29 : f32 to vector<1x1xf32>
    %67 = arith.subf %66, %65 : vector<1x1xf32>
    %68 = tpu.iota {dimensions = array<i32: 1>} : vector<1x128xi32>
    %c0_i32 = arith.constant 0 : i32
    %69 = vector.broadcast %c0_i32 : i32 to vector<1x128xi32>
    %70 = arith.cmpi eq, %68, %69 : vector<1x128xi32>
    %cst_30 = arith.constant 0.000000e+00 : f32
    %71 = vector.shape_cast %63 : vector<1x1xf32> to vector<1x1xf32>
    %72 = vector.broadcast %71 : vector<1x1xf32> to vector<1x128xf32>
    %73 = vector.broadcast %cst_30 : f32 to vector<1x128xf32>
    %74 = arith.select %70, %72, %73 : vector<1x128xi1>, vector<1x128xf32>
    %c1_i32 = arith.constant 1 : i32
    %75 = vector.broadcast %c1_i32 : i32 to vector<1x128xi32>
    %76 = arith.cmpi eq, %68, %75 : vector<1x128xi32>
    %cst_31 = arith.constant 0.000000e+00 : f32
    %77 = vector.shape_cast %67 : vector<1x1xf32> to vector<1x1xf32>
    %78 = vector.broadcast %77 : vector<1x1xf32> to vector<1x128xf32>
    %79 = vector.broadcast %cst_31 : f32 to vector<1x128xf32>
    %80 = arith.select %76, %78, %79 : vector<1x128xi1>, vector<1x128xf32>
    %81 = arith.addf %74, %80 : vector<1x128xf32>
    %c2_i32 = arith.constant 2 : i32
    %82 = vector.broadcast %c2_i32 : i32 to vector<1x128xi32>
    %83 = arith.cmpi eq, %68, %82 : vector<1x128xi32>
    %cst_32 = arith.constant 0.000000e+00 : f32
    %84 = vector.shape_cast %59 : vector<1x1xf32> to vector<1x1xf32>
    %85 = vector.broadcast %84 : vector<1x1xf32> to vector<1x128xf32>
    %86 = vector.broadcast %cst_32 : f32 to vector<1x128xf32>
    %87 = arith.select %83, %85, %86 : vector<1x128xi1>, vector<1x128xf32>
    %88 = arith.addf %81, %87 : vector<1x128xf32>
    %89 = vector.shape_cast %88 : vector<1x128xf32> to vector<1x1x128xf32>
    %90 = vector.broadcast %89 : vector<1x1x128xf32> to vector<1x8x128xf32>
    %c0_33 = arith.constant 0 : index
    %c0_34 = arith.constant 0 : index
    %c0_35 = arith.constant 0 : index
    %91 = vector.load %arg4[%c0_33, %c0_34, %c0_35] : memref<1x8x128xf32, #tpu.memory_space<vmem>>, vector<1x8x128xf32>
    tpu.vector_store %arg4[%c0_33, %c0_34, %c0_35], %90 {strides = array<i32>} : memref<1x8x128xf32, #tpu.memory_space<vmem>>, vector<1x8x128xf32>,
    return
  }
  func.func @transform_0(%arg0: i32) -> (i32, i32, i32, i32) {
    %c0_i32 = arith.constant 0 : i32
    %c0_i32_0 = arith.constant 0 : i32
    %c0_i32_1 = arith.constant 0 : i32
    %c0_i32_2 = arith.constant 0 : i32
    return %arg0, %c0_i32, %c0_i32_0, %c0_i32_1 : i32, i32, i32, i32
  }
  func.func @transform_1(%arg0: i32) -> (i32, i32, i32, i32) {
    %c0_i32 = arith.constant 0 : i32
    %c0_i32_0 = arith.constant 0 : i32
    %c0_i32_1 = arith.constant 0 : i32
    %c0_i32_2 = arith.constant 0 : i32
    return %arg0, %c0_i32, %c0_i32_0, %c0_i32_1 : i32, i32, i32, i32
  }
  func.func @transform_2(%arg0: i32) -> (i32, i32, i32, i32) {
    %c0_i32 = arith.constant 0 : i32
    %c0_i32_0 = arith.constant 0 : i32
    %c0_i32_1 = arith.constant 0 : i32
    %c0_i32_2 = arith.constant 0 : i32
    return %arg0, %c0_i32, %c0_i32_0, %c0_i32_1 : i32, i32, i32, i32
  }
  func.func @transform_3(%arg0: i32) -> (i32, i32, i32) {
    %c0_i32 = arith.constant 0 : i32
    %c0_i32_0 = arith.constant 0 : i32
    %c0_i32_1 = arith.constant 0 : i32
    return %arg0, %c0_i32, %c0_i32_0 : i32, i32, i32
  }
}

</mosaic_0001>

<bundles_post_ra>
// kernel: _forward_impl.3
= control target key start
LH: loop header
LB: loop body
LE: loop exit
PB: predicated region body
PF: predicated region fallthrough
CT: control target
= control target key end

     0   :  { %s750_s6 = smov 0   ;;  %s914_s0 = inlined_call_operand.vmem [shape: f32[3,93,6], index: 0, kind: input, shape index: {}]   ;;  %s915_s1 = inlined_call_operand.vmem [shape: f32[3,8,128], index: 1, kind: output, shape index: {}]  }
   0x1 LB: > { %s673_s7 = sadd.s32 4294967295, %s731_s6   ;;  %p677_p0 = scmp.ge.s32.totalorder %s731_s6, 1  ;;  %s731_s6 = sphi %s750_s6, %s11_s6  }
   0x2   : > { %p87_p1 = scmp.lt.s32.totalorder %s731_s6, 4 }
   0x4   : > { %p88_p2 = pnand %p677_p0, %p87_p1 }
   0x5   : > { %p106_p3 = scmp.lt.s32.totalorder (!%p88_p2), %s673_s7, 2  ;;  %vm136_vm0 = vcmask (!%p88_p2), 48128   ;;  %v733_v1 = vmov (!%p88_p2), 0.0   ;;  %v734_v23 = vmov (!%p88_p2), 2102212464  }
   0x6   : > { %91 = sbr.rel (%p88_p2) target bundleno = 535 (0x217), region = 24  ;;  %v735_v25 = vmov (!%p88_p2), 920167782   ;;  %v736_v29 = vmov (!%p88_p2), 1326507024  }
   0x7   : > { %v737_v31 = vmov (!%p88_p2), 683565275   ;;  %v738_v33 = vmov (!%p88_p2), 2475754826   ;;  %v739_v36 = vmov (!%p88_p2), 2131351028  }
   0xd   : > { %s917_s7 = smov (!%p106_p3, %s673_s7), 2 }
   0xe   : > { %s691_s8 = smul.u32 96, %s917_s7  ;;  %s679_s12 = sshll.u32 %s917_s7, 3 }
   0xf   : > { %s114_s15 = scalar_lea.vmem %s915_s1, %s679_s12 }
  0x10   : > { %s764_s11 = scalar_lea.vmem %s914_s0, %s691_s8 }
  0x11   : > { %v767_v0 = vld [vmem:[%s764_s11 + $0x55] sm:$0xff]  ;;  %v775_v11 = vld [vmem:[%s764_s11 + $0xd] sm:$0x1] }
  0x12   : > { %vm133_vm1 = vcmp.gt.f32.partialorder %v767_v0, 0.0  ;;  %v231_v12 = vand.u32 2139095040, %v775_v11  ;;  %v228_v22 = vand.u32 2147483647, %v775_v11  ;;  %vm230_vm11 = vcmp.lt.s32.totalorder %v775_v11, 0 }
  0x13   : > { %v680_v2 = vsel %vm133_vm1, 1.0, %v733_v1 }
  0x14   : > { %v137_v3 = vsel %vm136_vm0, %v680_v2, 0.0  ;;  %v232_v13 = vshrl.u32 %v231_v12, 23  ;;  %v235_v41 = vand.u32 8388607, %v228_v22  ;;  %vm229_vm12 = vcmp.le.f32.partialorder %v228_v22, 0.7853982 }
  0x15   : > { %v138_v4 = vrot.slane %v137_v3, 4  ;;  %v117_v22 = vld [vmem:[%s764_s11 + $0x4] sm:$0xf] }
  0x16   : > { %v681_v14 = vadd.s32 4294967169, %v232_v13  ;;  %v236_v47 = vor.u32 8388608, %v235_v41 }
  0x17   : > { %v139_v5 = vadd.f32 %v138_v4, %v137_v3 }
  0x18   : > { %v238_v15 = vadd.s32 1, %v681_v14  ;;  %v276_v56 = vshll.u32 %v236_v47, 8 }
  0x19   : > { %v140_v6 = vrot.slane %v139_v5, 2 }
  0x1a   : > { %vm239_vm2 = vcmp.gt.s32.totalorder %v238_v15, 0 }
  0x1b   : > { %v141_v7 = vadd.f32 %v140_v6, %v139_v5  ;;  %v240_v16 = vsel %vm239_vm2, %v238_v15, 0 }
  0x1c   : > { %v242_v17 = vand.u32 31, %v240_v16  ;;  %v241_v27 = vshrl.u32 %v240_v16, 5 }
  0x1d   : > { %v142_v8 = vrot.slane %v141_v7, 1 }
  0x1e   : > { %v243_v19 = vsub.s32 32, %v242_v17  ;;  %v254_v24 = vshll.u32 %v734_v23, %v242_v17  ;;  %v257_v28 = vshll.u32 %v735_v25, %v242_v17  ;;  %v245_v32 = vshll.u32 %v737_v31, %v242_v17 }
  0x1f   : > { %v143_v9 = vadd.f32 %v142_v8, %v141_v7  ;;  %v248_v35 = vshll.u32 %v738_v33, %v242_v17  ;;  %v251_v38 = vshll.u32 %v739_v36, %v242_v17  ;;  %vm263_vm3 = vcmp.lt.s32.totalorder %v241_v27, 4 }
  0x20   : > { %v255_v26 = vshrl.u32 %v735_v25, %v243_v19  ;;  %v258_v30 = vshrl.u32 %v736_v29, %v243_v19  ;;  %v246_v34 = vshrl.u32 %v738_v33, %v243_v19  ;;  %v249_v37 = vshrl.u32 %v739_v36, %v243_v19 }
  0x21   : > { %v144_v10 = vsel %vm136_vm0, %v143_v9, 0.0  ;;  %711 = vrcp.f32 %v143_v9  ;;  %v252_v39 = vshrl.u32 %v734_v23, %v243_v19  ;;  %vm260_vm4 = vcmp.lt.s32.totalorder %v241_v27, 1 }
  0x22   : > { %145 = vadd.xlane.f32.xlu0 %v144_v10  ;;  %v256_v40 = vor.u32 %v255_v26, %v254_v24  ;;  %v259_v42 = vor.u32 %v258_v30, %v257_v28  ;;  %v247_v43 = vor.u32 %v246_v34, %v245_v32  ;;  %v250_v44 = vor.u32 %v249_v37, %v248_v35 }
  0x23   : > { %v253_v45 = vor.u32 %v252_v39, %v251_v38  ;;  %vm262_vm5 = vcmp.lt.s32.totalorder %v241_v27, 3  ;;  %vm261_vm6 = vcmp.lt.s32.totalorder %v241_v27, 2  ;;  %v244_v1 = vshrl.u32 %v737_v31, %v243_v19  ;;  %v808_v31 = vld [vmem:[%s764_s11 + $0x2b] sm:$0xff] }
  0x24   : > { %v269_v46 = vsel %vm263_vm3, %v256_v40, 920167782  ;;  %v273_v48 = vsel %vm263_vm3, %v259_v42, 1326507024  ;;  %v268_v50 = vsel %vm260_vm4, %v247_v43, %v250_v44  ;;  %v163_v27 = vlaneseq }
  0x25   : > { %v270_v51 = vsel %vm262_vm5, %v253_v45, %v269_v46  ;;  %v272_v53 = vsel %vm260_vm4, %v250_v44, %v253_v45  ;;  %v274_v54 = vsel %vm262_vm5, %v256_v40, %v273_v48  ;;  %v265_v4 = vsel %vm263_vm3, %v253_v45, 2102212464  ;;  %v118_v40 = vld [vmem:[%s764_s11 + $0x8] sm:$0xf] }
  0x26   : > { %v271_v58 = vsel %vm261_vm6, %v268_v50, %v270_v51  ;;  %v275_v60 = vsel %vm261_vm6, %v272_v53, %v274_v54  ;;  %v264_v5 = vsel %vm260_vm4, %v244_v1, %v247_v43  ;;  %v266_v6 = vsel %vm262_vm5, %v250_v44, %v265_v4 }
  0x27   : > { %v793_v62 = vmul.u32.u64.low %v276_v56, %v271_v58  ;;  %v794_v63 = vmul.u32.u64.high %v276_v56, %v271_v58, %v793_v62  ;;  %v796_v2 = vmul.u32.u64.low %v276_v56, %v275_v60  ;;  %v797_v3 = vmul.u32.u64.high %v276_v56, %v275_v60, %v796_v2  ;;  %v832_v60 = vld [vmem:[%s764_s11 + $0xc] sm:$0x1] }
  0x28   : > { %v267_v7 = vsel %vm261_vm6, %v264_v5, %v266_v6  ;;  %v811_v32 = vshrl.u32 %v163_v27, 7  ;;  %v161_v35 = vmul.f32 %v808_v31, %v808_v31  ;;  %vm320_vm4 = vweird.f32 %v775_v11 }
  0x29   : > { %v286_v8 = vadd.s32 1, %v794_v63  ;;  %vm285_vm9 = vc.u32 %v797_v3, %v793_v62  ;;  %v283_v9 = vmul.u32 %v276_v56, %v267_v7  ;;  %v284_v24 = vadd.s32 %v793_v62, %v797_v3 }
  0x2a   : > { %v816_v36 = vsub.s32 0, %v811_v32  ;;  %v170_v37 = vsub.s32 1, %v811_v32  ;;  %v162_v41 = vmul.f32 %v161_v35, %v808_v31  ;;  %v176_v42 = vsub.s32 2, %v811_v32 }
  0x2b   : > { %v712_v18 = vpop.eup %711  ;;  %v287_v10 = vsel %vm285_vm9, %v286_v8, %v794_v63  ;;  %v182_v50 = vsub.s32 3, %v811_v32  ;;  %v214_v32 = vmul.f32 2.0, %v832_v60  ;;  %vm496_vm6 = vcmask 40960  }
  0x2c   : > { %v288_v12 = vadd.s32 %v287_v10, %v283_v9  ;;  %v188_v43 = vrot.slane %v118_v40, %v816_v36  ;;  %v193_v44 = vrot.slane %v118_v40, %v170_v37  ;;  %v199_v48 = vrot.slane %v118_v40, %v176_v42 }
  0x2d   : > { %v205_v56 = vrot.slane %v118_v40, %v182_v50  ;;  %v211_v63 = vrot.slane %v832_v60, %v816_v36  ;;  %v166_v7 = vrot.slane %v117_v22, %v816_v36  ;;  %v171_v8 = vrot.slane %v117_v22, %v170_v37 }
  0x2e   : > { %v289_v13 = vadd.s32 536870912, %v288_v12  ;;  %v189_v46 = vmul.f32 %v188_v43, %v162_v41  ;;  %v194_v47 = vmul.f32 %v193_v44, %v161_v35 }
  0x30   : > { %v290_v14 = vshrl.u32 %v289_v13, 30  ;;  %v195_v51 = vadd.f32 %v194_v47, %v189_v46 }
  0x32   : > { %v291_v15 = vshll.u32 %v290_v14, 30 }
  0x34   : > { %v292_v16 = vsub.s32 %v288_v12, %v291_v15  ;;  %v221_v12 = vmul.f32 5.0, %v832_v60  ;;  %v172_v15 = vmul.f32 %v171_v8, %v161_v35 }
  0x36   : > { %v294_v17 = vsub.s32 0, %v292_v16 }
  0xaf   : > { %v146_v20 = vpop.xlane.xlu0 %145 }
  0xb0   : > { %v148_v21 = vmul.f32 %v712_v18, %v146_v20  ;;  %v682_v18 = vmin.u32 %v294_v17, %v292_v16 }
  0xb2   : > { %713 = vrsqrt.f32 %v148_v21  ;;  %vm151_vm7 = vcmp.eq.f32.partialorder %v148_v21, inf  ;;  %v154_v55 = vand.u32 2147483648, %v148_v21  ;;  %vm153_vm8 = vcmp.eq.f32.partialorder %v148_v21, 0.0 }
  0xb3   : > { %v296_v19 = vclz %v682_v18 }
  0xb5   : > { %v683_v20 = vadd.s32 4294967294, %v296_v19  ;;  %v225_v19 = vrot.slane %v221_v12, %v816_v36  ;;  %v129_v12 = vld [vmem:[%s764_s11 + $0x43] sm:$0xff] }
  0xb7   : > { %vm684_vm10 = vcmp.lt.s32.totalorder %v683_v20, 0 }
  0xbc   : > { %v714_v49 = vpop.eup %713 }
  0xbd   : > { %v150_v52 = vmul.f32 %v714_v49, %v148_v21 }
  0xbf   : > { %v152_v57 = vsel %vm151_vm7, %v148_v21, %v150_v52  ;;  %v299_v21 = vsel %vm684_vm10, 0, %v683_v20  ;;  %v200_v52 = vmul.f32 %v199_v48, %v808_v31 }
  0xc0   : > { %v788_v59 = vsel %vm153_vm8, %v154_v55, %v152_v57  ;;  %v304_v23 = vsub.s32 4294967266, %v299_v21  ;;  %v300_v25 = vsub.s32 32, %v299_v21  ;;  %v301_v28 = vshll.u32 %v292_v16, %v299_v21 }
  0xc1   : > { %v156_v61 = vsel %vm136_vm0, %v788_v59, -inf  ;;  %v201_v55 = vadd.f32 %v200_v52, %v195_v51  ;;  %v314_v57 = vsub.s32 4, %v290_v14  ;;  %v177_v16 = vrot.slane %v117_v22, %v176_v42 }
  0xc2   : > { %157 = vmax.xlane.f32.xlu0 %v156_v61  ;;  %v305_v26 = vadd.s32 127, %v304_v23  ;;  %v302_v29 = vshrl.u32 %v284_v24, %v300_v25  ;;  %v459_v52 = vmul.f32 2015.0, %v832_v60 }
  0xc3   : > { %v829_v58 = vadd.f32 %v205_v56, %v201_v55  ;;  %v315_v61 = vsel %vm230_vm11, %v314_v57, %v290_v14  ;;  %v167_v14 = vmul.f32 %v166_v7, %v162_v41  ;;  %v178_v21 = vmul.f32 %v177_v16, %v808_v31 }
  0xc4   : > { %v306_v30 = vshll.u32 %v305_v26, 23  ;;  %v303_v33 = vor.u32 %v302_v29, %v301_v28  ;;  %v317_v1 = vsel %vm229_vm12, 0, %v315_v61  ;;  %v226_v26 = vmul.f32 %v225_v19, %v808_v31 }
  0xc5   : > { %v207_v62 = vmul.f32 0.3, %v829_v58  ;;  %v321_v5 = vand.u32 3, %v317_v1  ;;  %v424_v6 = vadd.s32 3, %v317_v1  ;;  %v173_v20 = vadd.f32 %v172_v15, %v167_v14  ;;  %v122_v15 = vld [vmem:[%s764_s11 + $0x19] sm:$0xff] }
  0xc6   : > { %v307_v34 = vor.u32 4788187, %v306_v30  ;;  %v310_v39 = vcvt.s32.f32 %v303_v33  ;;  %v183_v30 = vrot.slane %v117_v22, %v182_v50  ;;  %v463_v56 = vrot.slane %v459_v52, %v816_v36  ;;  %v131_v52 = vld [vmem:[%s764_s11 + $0x54] sm:$0x1] }
  0xc7   : > { %v212_v3 = vsub.f32 %v211_v63, %v207_v62  ;;  %vm323_vm13 = vcmp.eq.s32.totalorder %v321_v5, 0  ;;  %vm326_vm14 = vcmp.eq.s32.totalorder %v321_v5, 2  ;;  %v425_v13 = vand.u32 3, %v424_v6  ;;  %v125_v63 = vld [vmem:[%s764_s11 + $0x23] sm:$0xff] }
  0xc8   : > { %v308_v38 = vand.u32 2147483647, %v307_v34  ;;  %vm322_vm15 = vcmp.lt.s32.totalorder %v321_v5, 2  ;;  %v179_v29 = vadd.f32 %v178_v21, %v173_v20 }
  0xc9   : > { %vm427_vm2 = vcmp.eq.s32.totalorder %v425_v13, 0  ;;  %vm430_vm3 = vcmp.eq.s32.totalorder %v425_v13, 2  ;;  %vm426_vm5 = vcmp.lt.s32.totalorder %v425_v13, 2 }
  0xca   : > { %v311_v45 = vmul.f32 %v310_v39, %v308_v38  ;;  %v184_v38 = vadd.f32 %v183_v30, %v179_v29  ;;  %v218_v39 = vrot.slane %v214_v32, %v816_v36 }
  0xcc   : > { %v312_v49 = vxor.u32 2147483648, %v311_v45  ;;  %v219_v42 = vmul.f32 %v218_v39, %v184_v38  ;;  %v466_v5 = vsub.f32 %v184_v38, %v125_v63 }
  0xce   : > { %v313_v53 = vsel %vm230_vm11, %v312_v49, %v311_v45  ;;  %v467_v13 = vand.u32 2147483647, %v466_v5 }
  0xcf   : > { %v316_v54 = vsel %vm229_vm12, %v775_v11, %v313_v53 }
  0xd0   : > { %715 = vcosq.f32 %v316_v54 }
  0xd1   : > { %717 = vsinq.f32 %v316_v54 }
  0xd2   : > { %719 = vrcp.f32 %v212_v3  ;;  %v127_v3 = vld [vmem:[%s764_s11 + $0x33] sm:$0xff] }
  0xda   : > { %v716_v2 = vpop.eup %715 }
  0xdb   : > { %v718_v4 = vpop.eup %717  ;;  %v327_v10 = vxor.u32 2147483648, %v716_v2 }
  0xdc   : > { %v324_v9 = vxor.u32 2147483648, %v718_v4  ;;  %v720_v28 = vpop.eup %719 }
  0xdd   : > { %v328_v18 = vsel %vm326_vm14, %v327_v10, %v718_v4  ;;  %v432_v25 = vsel %vm430_vm3, %v327_v10, %v718_v4  ;;  %v227_v35 = vmul.f32 %v720_v28, %v226_v26  ;;  %v220_v46 = vmul.f32 %v720_v28, %v219_v42  ;;  %v121_v4 = vld [vmem:[%s764_s11 + $0x11] sm:$0xff] }
  0xde   : > { %v325_v17 = vsel %vm323_vm13, %v716_v2, %v324_v9  ;;  %v429_v24 = vsel %vm427_vm2, %v716_v2, %v324_v9  ;;  %v128_v2 = vld [vmem:[%s764_s11 + $0x3b] sm:$0xff]  ;;  %v480_v9 = vsub.f32 %v829_v58, %v127_v3 }
  0xdf   : > { %v329_v23 = vsel %vm322_vm15, %v325_v17, %v328_v18  ;;  %v433_v34 = vsel %vm426_vm5, %v429_v24, %v432_v25  ;;  %v441_v49 = vmul.f32 2015.0, %v220_v46  ;;  %v509_v1 = vmul.f32 0.5, %v220_v46  ;;  %v123_v24 = vld [vmem:[%s764_s11 + $0x21] sm:$0x1] }
  0xe0   : > { %v330_v33 = vsel %vm320_vm4, nan, %v329_v23  ;;  %v434_v40 = vsel %vm320_vm4, nan, %v433_v34  ;;  %v524_v6 = vmul.f32 0.2, %v227_v35  ;;  %v481_v18 = vand.u32 2147483647, %v480_v9 }
  0xe1   : > { %v438_v37 = vrot.slane %v330_v33, %v816_v36  ;;  %v450_v31 = vsub.f32 0.0, %v434_v40  ;;  %v442_v43 = vmul.f32 960.0, %v330_v33  ;;  %v452_v45 = vmul.f32 540.0, %v330_v33  ;;  %v115_v23 = vld [vmem:[%s764_s11 + $0x2] sm:$0x1] }
  0xe2   : > { %v510_v8 = vsub.f32 %v509_v1, %v128_v2  ;;  %v525_v14 = vsub.f32 %v524_v6, %v129_v12  ;;  %v494_v32 = vsub.f32 %v115_v23, %v123_v24 }
  0xe3   : > { %v439_v41 = vmul.f32 %v438_v37, %v227_v35  ;;  %v451_v44 = vmul.f32 2015.0, %v450_v31  ;;  %v446_v47 = vrot.slane %v442_v43, %v816_v36  ;;  %v116_v43 = vld [vmem:[%s764_s11 + $0x3] sm:$0x1] }
  0xe4   : > { %v511_v17 = vand.u32 2147483647, %v510_v8  ;;  %v526_v25 = vand.u32 2147483647, %v525_v14  ;;  %v495_v31 = vand.u32 2147483647, %v494_v32 }
  0xe5   : > { %721 = vrcp.f32 %v439_v41  ;;  %v453_v48 = vadd.f32 %v452_v45, %v451_v44  ;;  %v447_v50 = vmul.f32 %v446_v47, %v227_v35  ;;  %v124_v44 = vld [vmem:[%s764_s11 + $0x22] sm:$0x1] }
  0xe7   : > { %v457_v51 = vrot.slane %v453_v48, %v816_v36  ;;  %v448_v53 = vadd.f32 %v447_v50, %v441_v49  ;;  %v497_v49 = vsel %vm496_vm6, %v495_v31, 0.0  ;;  %v502_v50 = vsub.f32 %v116_v43, %v124_v44 }
  0xe9   : > { %v458_v55 = vmul.f32 %v457_v51, %v227_v35  ;;  %v130_v35 = vld [vmem:[%s764_s11 + $0x53] sm:$0x1] }
  0xea   : > { %v569_v42 = vsub.f32 %v832_v60, %v130_v35 }
  0xeb   : > { %v464_v62 = vadd.f32 %v463_v56, %v458_v55  ;;  %v576_v56 = vsub.f32 %v775_v11, %v131_v52 }
  0xec   : > { %v570_v51 = vand.u32 2147483647, %v569_v42 }
  0xee   : > { %v571_v55 = vsel %vm496_vm6, %v570_v51, 0.0 }
  0xef   : > { %v722_v54 = vpop.eup %721 }
  0xf0   : > { %v449_v57 = vmul.f32 %v722_v54, %v448_v53  ;;  %v465_v7 = vmul.f32 %v722_v54, %v464_v62  ;;  %v503_v54 = vand.u32 2147483647, %v502_v50  ;;  %v577_v62 = vand.u32 2147483647, %v576_v56 }
  0xf2   : > { %v539_v22 = vmul.f32 0.00052083336, %v449_v57  ;;  %v554_v16 = vmul.f32 0.0009259259, %v465_v7  ;;  %v578_v63 = vsel %vm496_vm6, %v577_v62, 0.0 }
  0xf4   : > { %v540_v10 = vsub.f32 %v539_v22, %v121_v4  ;;  %v555_v26 = vsub.f32 %v554_v16, %v122_v15 }
  0xf6   : > { %v541_v19 = vand.u32 2147483647, %v540_v10  ;;  %v556_v41 = vand.u32 2147483647, %v555_v26 }
 0x14f   : > { %v158_v61 = vpop.xlane.xlu0 %157 }
 0x150   : > { %723 = vrcp.f32 %v158_v61  ;;  %v504_v61 = vsel %vm496_vm6, %v503_v54, 0.0 }
 0x15a   : > { %v724_v20 = vpop.eup %723 }
 0x15b   : > { %v160_v21 = vmul.f32 %v724_v20, %v788_v59  ;;  %v894_v20 = vand.u32 127, %v163_v27 }
 0x15d   : > { %v468_v28 = vmul.f32 %v467_v13, %v160_v21  ;;  %v512_v29 = vmul.f32 %v511_v17, %v160_v21  ;;  %v482_v58 = vmul.f32 %v481_v18, %v160_v21  ;;  %v542_v30 = vmul.f32 %v541_v19, %v160_v21 }
 0x15e   : > { %v527_v40 = vmul.f32 %v526_v25, %v160_v21  ;;  %v557_v48 = vmul.f32 %v556_v41, %v160_v21  ;;  %vm591_vm7 = vcmp.eq.s32.totalorder %v894_v20, 2  ;;  %vm594_vm8 = vcmp.eq.s32.totalorder %v894_v20, 3 }
 0x15f   : > { %v469_v33 = vsel %vm133_vm1, %v468_v28, 0.0  ;;  %v513_v34 = vsel %vm133_vm1, %v512_v29, 0.0  ;;  %v483_v38 = vsel %vm133_vm1, %v482_v58, 0.0  ;;  %v543_v39 = vsel %vm133_vm1, %v542_v30, 0.0 }
 0x160   : > { %v470_v59 = vsel %vm136_vm0, %v469_v33, 0.0  ;;  %v514_v37 = vsel %vm136_vm0, %v513_v34, 0.0  ;;  %v484_v45 = vsel %vm136_vm0, %v483_v38, 0.0  ;;  %v544_v46 = vsel %vm136_vm0, %v543_v39, 0.0 }
 0x161   : > { %471 = vadd.xlane.f32.xlu1 %v470_v59  ;;  %515 = vadd.xlane.f32.xlu0 %v514_v37  ;;  %v528_v47 = vsel %vm133_vm1, %v527_v40, 0.0  ;;  %v558_v53 = vsel %vm133_vm1, %v557_v48, 0.0  ;;  %vm588_vm1 = vcmp.eq.s32.totalorder %v894_v20, 1  ;;  %vm597_vm9 = vcmp.eq.s32.totalorder %v894_v20, 4 }
 0x162   : > { %v529_v60 = vsel %vm136_vm0, %v528_v47, 0.0  ;;  %v559_v57 = vsel %vm136_vm0, %v558_v53, 0.0  ;;  %vm585_vm0 = vcmp.eq.s32.totalorder %v894_v20, 0  ;;  %vm600_vm10 = vcmp.eq.s32.totalorder %v894_v20, 5 }
 0x163   : > { %vm603_vm11 = vcmp.eq.s32.totalorder %v894_v20, 6  ;;  %vm606_vm12 = vcmp.eq.s32.totalorder %v894_v20, 7  ;;  %vm609_vm13 = vcmp.eq.s32.totalorder %v894_v20, 8  ;;  %vm612_vm14 = vcmp.eq.s32.totalorder %v894_v20, 9 }
 0x165   : > { %485 = vadd.xlane.f32.xlu1 %v484_v45  ;;  %545 = vadd.xlane.f32.xlu0 %v544_v46 }
 0x169   : > { %530 = vadd.xlane.f32.xlu1 %v529_v60  ;;  %498 = vadd.xlane.f32.xlu0 %v497_v49 }
 0x16d   : > { %560 = vadd.xlane.f32.xlu1 %v559_v57  ;;  %572 = vadd.xlane.f32.xlu0 %v571_v55 }
 0x171   : > { %505 = vadd.xlane.f32.xlu1 %v504_v61 }
 0x175   : > { %579 = vadd.xlane.f32.xlu1 %v578_v63 }
 0x1ee   : > { %v472_v1 = vpop.xlane.xlu1 %471  ;;  %v516_v0 = vpop.xlane.xlu0 %515 }
 0x1ef   : > { %v473_v22 = vrot.slane %v472_v1, 4  ;;  %v517_v2 = vrot.slane %v516_v0, 4 }
 0x1f1   : > { %v474_v3 = vadd.f32 %v473_v22, %v472_v1  ;;  %v518_v4 = vadd.f32 %v517_v2, %v516_v0 }
 0x1f2   : > { %v486_v5 = vpop.xlane.xlu1 %485  ;;  %v546_v6 = vpop.xlane.xlu0 %545 }
 0x1f3   : > { %v475_v11 = vrot.slane %v474_v3, 2  ;;  %v519_v7 = vrot.slane %v518_v4, 2  ;;  %v487_v8 = vrot.slane %v486_v5, 4  ;;  %v547_v9 = vrot.slane %v546_v6, 4 }
 0x1f5   : > { %v476_v10 = vadd.f32 %v475_v11, %v474_v3  ;;  %v488_v12 = vadd.f32 %v487_v8, %v486_v5  ;;  %v548_v13 = vadd.f32 %v547_v9, %v546_v6  ;;  %v520_v16 = vadd.f32 %v519_v7, %v518_v4 }
 0x1f6   : > { %v531_v14 = vpop.xlane.xlu1 %530  ;;  %v499_v26 = vpop.xlane.xlu0 %498 }
 0x1f7   : > { %v477_v15 = vrot.slane %v476_v10, 1  ;;  %v489_v17 = vrot.slane %v488_v12, 2  ;;  %v549_v18 = vrot.slane %v548_v13, 2  ;;  %v532_v19 = vrot.slane %v531_v14, 4 }
 0x1f8   : > { %v521_v28 = vrot.slane %v520_v16, 1  ;;  %v501_v35 = vmul.f32 0.16666667, %v499_v26 }
 0x1f9   : > { %v478_v21 = vadd.f32 %v477_v15, %v476_v10  ;;  %v490_v23 = vadd.f32 %v489_v17, %v488_v12  ;;  %v533_v24 = vadd.f32 %v532_v19, %v531_v14  ;;  %v550_v58 = vadd.f32 %v549_v18, %v548_v13 }
 0x1fa   : > { %v561_v25 = vpop.xlane.xlu1 %560  ;;  %v522_v38 = vadd.f32 %v521_v28, %v520_v16  ;;  %v592_v45 = vsel %vm591_vm7, %v501_v35, 0.0  ;;  %v573_v56 = vpop.xlane.xlu0 %572 }
 0x1fb   : > { %v491_v29 = vrot.slane %v490_v23, 1  ;;  %v534_v30 = vrot.slane %v533_v24, 2  ;;  %v562_v32 = vrot.slane %v561_v25, 4  ;;  %v479_v33 = vmul.f32 0.16666667, %v478_v21 }
 0x1fc   : > { %v551_v40 = vrot.slane %v550_v58, 1  ;;  %v523_v49 = vmul.f32 0.16666667, %v522_v38  ;;  %v575_v22 = vmul.f32 0.16666667, %v573_v56 }
 0x1fd   : > { %v492_v34 = vadd.f32 %v491_v29, %v490_v23  ;;  %v535_v59 = vadd.f32 %v534_v30, %v533_v24  ;;  %v563_v37 = vadd.f32 %v562_v32, %v561_v25  ;;  %v586_v43 = vsel %vm585_vm0, %v479_v33, 0.0 }
 0x1fe   : > { %v506_v27 = vpop.xlane.xlu1 %505  ;;  %v552_v50 = vadd.f32 %v551_v40, %v550_v58  ;;  %v598_v61 = vsel %vm597_vm9, %v523_v49, 0.0  ;;  %v610_v11 = vsel %vm609_vm13, %v575_v22, 0.0 }
 0x1ff   : > { %v493_v39 = vmul.f32 0.16666667, %v492_v34  ;;  %v508_v41 = vmul.f32 0.16666667, %v506_v27  ;;  %v536_v31 = vrot.slane %v535_v59, 1  ;;  %v564_v42 = vrot.slane %v563_v37, 2 }
 0x200   : > { %v553_v57 = vmul.f32 0.16666667, %v552_v50 }
 0x201   : > { %v589_v44 = vsel %vm588_vm1, %v493_v39, 0.0  ;;  %v537_v46 = vadd.f32 %v536_v31, %v535_v59  ;;  %v565_v47 = vadd.f32 %v564_v42, %v563_v37  ;;  %v595_v51 = vsel %vm594_vm8, %v508_v41, 0.0 }
 0x202   : > { %v590_v48 = vadd.f32 %v589_v44, %v586_v43  ;;  %v580_v63 = vpop.xlane.xlu1 %579  ;;  %v604_v3 = vsel %vm603_vm11, %v553_v57, 0.0 }
 0x203   : > { %v566_v52 = vrot.slane %v565_v47, 1  ;;  %v538_v53 = vmul.f32 0.16666667, %v537_v46  ;;  %v582_v4 = vmul.f32 0.16666667, %v580_v63 }
 0x204   : > { %v593_v60 = vadd.f32 %v592_v45, %v590_v48 }
 0x205   : > { %v567_v54 = vadd.f32 %v566_v52, %v565_v47  ;;  %v601_v1 = vsel %vm600_vm10, %v538_v53, 0.0  ;;  %v613_v8 = vsel %vm612_vm14, %v582_v4, 0.0 }
 0x206   : > { %v596_v55 = vadd.f32 %v595_v51, %v593_v60 }
 0x207   : > { %v568_v0 = vmul.f32 0.16666667, %v567_v54 }
 0x208   : > { %v599_v62 = vadd.f32 %v598_v61, %v596_v55 }
 0x209   : > { %v607_v6 = vsel %vm606_vm12, %v568_v0, 0.0 }
 0x20a   : > { %v602_v2 = vadd.f32 %v601_v1, %v599_v62 }
 0x20c   : > { %v605_v5 = vadd.f32 %v604_v3, %v602_v2 }
 0x20e   : > { %v608_v7 = vadd.f32 %v607_v6, %v605_v5 }
 0x210   : > { %v611_v9 = vadd.f32 %v610_v11, %v608_v7 }
 0x212   : > { %v614_v10 = vadd.f32 %v613_v8, %v611_v9 }
 0x214   : > { %v618_v12 = vrot.slane %v614_v10, %v816_v36 }
 0x216   : > { %619 = vst [vmem:[%s114_s15] sm:$0xff] %v618_v12 }
 0x217 PF: > { %s11_s6 = sadd.s32 1, %s731_s6  }
 0x218   : > { %p8_p4 = scmp.ge.s32.totalorder %s11_s6, 5  }
 0x21a   :  { %10 = sbr.rel (!%p8_p4) target bundleno = 1 (0x1), region = 54 }

// kernel: _forward_impl.2
= control target key start
LH: loop header
LB: loop body
LE: loop exit
PB: predicated region body
PF: predicated region fallthrough
CT: control target
= control target key end

     0   :  { %s546_s12 = smov 0   ;;  %s634_s0 = inlined_call_operand.vmem [shape: f32[3,2,8,4], index: 0, kind: input, shape index: {}]   ;;  %s635_s1 = inlined_call_operand.vmem [shape: s32[3,2,8,1], index: 1, kind: input, shape index: {}]   ;;  %s636_s2 = inlined_call_operand.vmem [shape: f32[3,2,8,1], index: 2, kind: input, shape index: {}]   ;;  %s637_s3 = inlined_call_operand.vmem [shape: f32[3,8,128], index: 3, kind: output, shape index: {}]  }
   0x1 LB: > { %s467_s13 = sadd.s32 4294967295, %s521_s12   ;;  %p471_p0 = scmp.ge.s32.totalorder %s521_s12, 1  ;;  %s521_s12 = sphi %s546_s12, %s13_s12  }
   0x2   : > { %p157_p1 = scmp.lt.s32.totalorder %s521_s12, 4 }
   0x4   : > { %p158_p2 = pnand %p471_p0, %p157_p1 }
   0x5   : > { %p190_p3 = scmp.lt.s32.totalorder (!%p158_p2), %s467_s13, 2  ;;  %v523_v0 = vmov (!%p158_p2), 0   ;;  %vm229_vm0 = vcmask (!%p158_p2), 31744   ;;  %v215_v12 = vlaneseq (!%p158_p2)  ;;  %v524_v22 = vmov (!%p158_p2), 0.0  }
   0x6   : > { %161 = sbr.rel (%p158_p2) target bundleno = 493 (0x1ed), region = 32  ;;  %503 = vset.pattern.permute.xlu1 (!%p158_p2), %v523_v0  ;;  %504 = vset.pattern.permute.xlu0 (!%p158_p2), %v523_v0  ;;  %v525_v33 = vmov (!%p158_p2), 1.0   ;;  %vm297_vm7 = vcmask (!%p158_p2), 7168  }
   0x7   : > { %v581_v14 = vand.u32 (!%p158_p2), 127, %v215_v12 }
   0x9   : > { %v270_v16 = vcvt.s32.f32 (!%p158_p2), %v581_v14  ;;  %vm378_vm12 = vcmp.eq.s32.totalorder (!%p158_p2), %v581_v14, 1  ;;  %vm371_vm13 = vcmp.eq.s32.totalorder (!%p158_p2), %v581_v14, 0  ;;  %vm386_vm14 = vcmp.eq.s32.totalorder (!%p158_p2), %v581_v14, 2 }
   0xd   : > { %s639_s13 = smov (!%p190_p3, %s467_s13), 2 }
   0xe   : > { %s557_s14 = sshll.u32 %s639_s13, 4  ;;  %s478_s24 = sshll.u32 %s639_s13, 3 }
   0xf   : > { %s194_s17 = scalar_lea.vmem %s634_s0, %s557_s14  ;;  %s199_s20 = scalar_lea.vmem %s635_s1, %s557_s14 }
  0x10   : > { %v209_v1 = vld [vmem:[%s194_s17] sm:$0xff]  ;;  %v210_v2 = vld [vmem:[%s194_s17 + $0x8] sm:$0xff]  ;;  %s204_s23 = scalar_lea.vmem %s636_s2, %s557_s14  ;;  %s208_s27 = scalar_lea.vmem %s637_s3, %s478_s24 }
  0x11   : > { %v567_v3 = vld [vmem:[%s199_s20] sm:$0xff]  ;;  %v230_v4 = vsel %vm229_vm0, %v209_v1, -inf  ;;  %v571_v5 = vld [vmem:[%s199_s20 + $0x8] sm:$0xff]  ;;  %v233_v6 = vsel %vm229_vm0, %v210_v2, -inf }
  0x12   : > { %218 = vperm.xlu1 %503, %v567_v3   ;;  %231 = vmax.xlane.f32.xlu0 %v230_v4  ;;  %vm262_vm5 = vcmp.eq.s32.totalorder %v567_v3, 3  ;;  %vm263_vm6 = vcmp.eq.s32.totalorder %v571_v5, 3  ;;  %v285_v43 = vcvt.s32.f32 %v567_v3  ;;  %v213_v47 = vld [vmem:[%s204_s23] sm:$0xff]  ;;  %v286_v49 = vcvt.s32.f32 %v571_v5  ;;  %v214_v56 = vld [vmem:[%s204_s23 + $0x8] sm:$0xff] }
  0x13   : > { %v596_v34 = vsel %vm262_vm5, 0.1, %v525_v33  ;;  %v598_v35 = vsel %vm263_vm6, 0.1, %v525_v33 }
  0x14   : > { %v315_v36 = vsel %vm297_vm7, %v596_v34, 0.0  ;;  %v322_v37 = vsel %vm297_vm7, %v598_v35, 0.0 }
  0x15   : > { %v316_v38 = vrot.slane %v315_v36, 4  ;;  %v323_v39 = vrot.slane %v322_v37, 4 }
  0x16   : > { %221 = vperm.xlu1 %503, %v571_v5   ;;  %234 = vmax.xlane.f32.xlu0 %v233_v6 }
  0x17   : > { %v317_v40 = vadd.f32 %v316_v38, %v315_v36  ;;  %v324_v41 = vadd.f32 %v323_v39, %v322_v37 }
  0x19   : > { %v318_v44 = vrot.slane %v317_v40, 2  ;;  %v325_v45 = vrot.slane %v324_v41, 2 }
  0x1b   : > { %v319_v52 = vadd.f32 %v318_v44, %v317_v40  ;;  %v326_v55 = vadd.f32 %v325_v45, %v324_v41 }
  0x1d   : > { %v320_v63 = vrot.slane %v319_v52, 1  ;;  %v327_v4 = vrot.slane %v326_v55, 1 }
  0x91   : > { %v219_v15 = vpop.permute.xlu1 %218 }
  0x92   : > { %vm223_vm2 = vcmp.eq.s32.totalorder %v581_v14, %v219_v15 }
  0x93   : > { %v479_v23 = vsel %vm223_vm2, 1.0, %v524_v22 }
  0x94   : > { %v254_v27 = vmul.f32 %v479_v23, %v209_v1 }
  0x95   : > { %v222_v20 = vpop.permute.xlu1 %221 }
  0x96   : > { %vm224_vm4 = vcmp.eq.s32.totalorder %v581_v14, %v222_v20  ;;  %v256_v30 = vsel %vm229_vm0, %v254_v27, 0.0  ;;  %v321_v20 = vadd.f32 %v320_v63, %v319_v52 }
  0x97   : > { %v480_v28 = vsel %vm224_vm4, 1.0, %v524_v22 }
  0x98   : > { %v255_v31 = vmul.f32 %v480_v28, %v210_v2 }
  0x9a   : > { %v259_v32 = vsel %vm229_vm0, %v255_v31, 0.0 }
  0x9f   : > { %v575_v7 = vpop.xlane.xlu0 %231 }
  0xa0   : > { %v236_v8 = vsub.f32 %v209_v1, %v575_v7  ;;  %vm268_vm1 = vcmp.eq.f32.partialorder %v209_v1, %v575_v7 }
  0xa1   : > { %v271_v19 = vsel %vm268_vm1, %v270_v16, 4.0 }
  0xa2   : > { %v238_v9 = vmul.f32 1.442695, %v236_v8  ;;  %v273_v24 = vsel %vm229_vm0, %v271_v19, inf }
  0xa3   : > { %v578_v10 = vpop.xlane.xlu0 %234 }
  0xa4   : > { %505 = vpow2.f32 %v238_v9  ;;  %v237_v11 = vsub.f32 %v210_v2, %v578_v10  ;;  %vm269_vm3 = vcmp.eq.f32.partialorder %v210_v2, %v578_v10 }
  0xa5   : > { %v272_v26 = vsel %vm269_vm3, %v270_v16, 4.0 }
  0xa6   : > { %v240_v13 = vmul.f32 1.442695, %v237_v11  ;;  %v276_v29 = vsel %vm229_vm0, %v272_v26, inf }
  0xa8   : > { %507 = vpow2.f32 %v240_v13 }
  0xae   : > { %v506_v17 = vpop.eup %505 }
  0xaf   : > { %v242_v18 = vsel %vm229_vm0, %v506_v17, 0.0 }
  0xb0   : > { %243 = vadd.xlane.f32.xlu0 %v242_v18 }
  0xb2   : > { %v508_v21 = vpop.eup %507 }
  0xb3   : > { %v245_v25 = vsel %vm229_vm0, %v508_v21, 0.0  ;;  %v328_v21 = vadd.f32 %v327_v4, %v326_v55 }
  0xb4   : > { %274 = vmin.xlane.f32.xlu0 %v273_v24  ;;  %246 = vadd.xlane.f32.xlu1 %v245_v25 }
  0xb5   : > { %v330_v33 = vsel %vm297_vm7, %v328_v21, 0.0 }
  0xb8   : > { %277 = vmin.xlane.f32.xlu0 %v276_v29 }
  0xbc   : > { %257 = vadd.xlane.f32.xlu0 %v256_v30 }
  0xc0   : > { %260 = vadd.xlane.f32.xlu0 %v259_v32 }
 0x13d   : > { %v244_v42 = vpop.xlane.xlu0 %243 }
 0x13e   : > { %509 = vlog2.f32 %v244_v42 }
 0x141   : > { %v247_v46 = vpop.xlane.xlu1 %246  ;;  %v275_v48 = vpop.xlane.xlu0 %274 }
 0x142   : > { %511 = vlog2.f32 %v247_v46  ;;  %vm279_vm8 = vcmp.ne.f32.partialorder %v275_v48, 3.0  ;;  %vm287_vm9 = vcmp.eq.f32.partialorder %v275_v48, %v285_v43 }
 0x143   : > { %v481_v50 = vsel %vm279_vm8, 1.0, %v524_v22  ;;  %v483_v51 = vsel %vm287_vm9, 1.0, %v524_v22 }
 0x144   : > { %v293_v53 = vmul.f32 %v483_v51, %v213_v47  ;;  %v332_v54 = vrot.slane %v481_v50, 4 }
 0x145   : > { %v278_v57 = vpop.xlane.xlu0 %277 }
 0x146   : > { %v333_v58 = vadd.f32 %v481_v50, %v332_v54  ;;  %v350_v59 = vsel %vm297_vm7, %v293_v53, 0.0  ;;  %vm280_vm10 = vcmp.ne.f32.partialorder %v278_v57, 3.0  ;;  %vm288_vm11 = vcmp.eq.f32.partialorder %v278_v57, %v286_v49 }
 0x147   : > { %v351_v60 = vrot.slane %v350_v59, 4  ;;  %v482_v61 = vsel %vm280_vm10, 1.0, %v524_v22  ;;  %v484_v62 = vsel %vm288_vm11, 1.0, %v524_v22 }
 0x148   : > { %v510_v0 = vpop.eup %509  ;;  %v334_v1 = vrot.slane %v333_v58, 2  ;;  %v294_v2 = vmul.f32 %v484_v62, %v214_v56  ;;  %v338_v3 = vrot.slane %v482_v61, 4 }
 0x149   : > { %v249_v5 = vmul.f32 0.6931472, %v510_v0  ;;  %v352_v6 = vadd.f32 %v351_v60, %v350_v59  ;;  %v258_v12 = vpop.xlane.xlu0 %257 }
 0x14a   : > { %v335_v8 = vadd.f32 %v334_v1, %v333_v58  ;;  %v339_v9 = vadd.f32 %v482_v61, %v338_v3  ;;  %v357_v11 = vsel %vm297_vm7, %v294_v2, 0.0 }
 0x14b   : > { %v353_v13 = vrot.slane %v352_v6, 2  ;;  %v358_v15 = vrot.slane %v357_v11, 4  ;;  %v252_v16 = vadd.f32 %v249_v5, %v575_v7  ;;  %v329_v7 = vsel %vm297_vm7, %v321_v20, 0.0 }
 0x14c   : > { %v512_v17 = vpop.eup %511  ;;  %v336_v18 = vrot.slane %v335_v8, 1  ;;  %v340_v19 = vrot.slane %v339_v9, 2  ;;  %v331_v43 = vadd.f32 %v330_v33, %v329_v7 }
 0x14d   : > { %v251_v22 = vmul.f32 0.6931472, %v512_v17  ;;  %v354_v23 = vadd.f32 %v353_v13, %v352_v6  ;;  %v359_v24 = vadd.f32 %v358_v15, %v357_v11  ;;  %v266_v25 = vsub.f32 %v252_v16, %v258_v12  ;;  %v261_v36 = vpop.xlane.xlu0 %260 }
 0x14e   : > { %v337_v26 = vadd.f32 %v336_v18, %v335_v8  ;;  %v341_v27 = vadd.f32 %v340_v19, %v339_v9  ;;  %513 = vrcp.f32 %v331_v43 }
 0x14f   : > { %v360_v28 = vrot.slane %v359_v24, 2  ;;  %v295_v29 = vmul.f32 %v266_v25, %v596_v34  ;;  %v253_v30 = vadd.f32 %v251_v22, %v578_v10  ;;  %v355_v31 = vrot.slane %v354_v23, 1 }
 0x150   : > { %v342_v32 = vrot.slane %v341_v27, 1  ;;  %v485_v40 = vadd.f32 -3.0, %v337_v26 }
 0x151   : > { %v361_v37 = vadd.f32 %v360_v28, %v359_v24  ;;  %v298_v38 = vsel %vm297_vm7, %v295_v29, 0.0  ;;  %v267_v39 = vsub.f32 %v253_v30, %v261_v36  ;;  %v356_v34 = vadd.f32 %v355_v31, %v354_v23 }
 0x152   : > { %v343_v41 = vadd.f32 %v342_v32, %v341_v27  ;;  %v299_v42 = vrot.slane %v298_v38, 4  ;;  %v346_v49 = vand.u32 2147483647, %v485_v40 }
 0x153   : > { %v296_v44 = vmul.f32 %v267_v39, %v598_v35  ;;  %v362_v45 = vrot.slane %v361_v37, 1  ;;  %v364_v53 = vsel %vm297_vm7, %v356_v34, 0.0 }
 0x154   : > { %v486_v10 = vadd.f32 -3.0, %v343_v41  ;;  %v300_v46 = vadd.f32 %v299_v42, %v298_v38 }
 0x155   : > { %v305_v47 = vsel %vm297_vm7, %v296_v44, 0.0  ;;  %v363_v48 = vadd.f32 %v362_v45, %v361_v37 }
 0x156   : > { %v347_v50 = vand.u32 2147483647, %v486_v10  ;;  %v301_v51 = vrot.slane %v300_v46, 2  ;;  %v306_v52 = vrot.slane %v305_v47, 4 }
 0x157   : > { %v365_v54 = vsel %vm297_vm7, %v363_v48, 0.0 }
 0x158   : > { %v302_v55 = vadd.f32 %v301_v51, %v300_v46  ;;  %v307_v56 = vadd.f32 %v306_v52, %v305_v47  ;;  %v366_v57 = vadd.f32 %v365_v54, %v364_v53  ;;  %v348_v35 = vadd.f32 %v347_v50, %v346_v49  ;;  %v514_v2 = vpop.eup %513 }
 0x15a   : > { %v303_v58 = vrot.slane %v302_v55, 1  ;;  %v308_v59 = vrot.slane %v307_v56, 2  ;;  %v369_v60 = vmul.f32 16.666666, %v366_v57  ;;  %v349_v9 = vmul.f32 0.5, %v348_v35 }
 0x15c   : > { %v309_v61 = vadd.f32 %v308_v59, %v307_v56  ;;  %v370_v62 = vsub.f32 100.0, %v369_v60  ;;  %v304_v0 = vadd.f32 %v303_v58, %v302_v55  ;;  %v387_v16 = vsel %vm386_vm14, %v349_v9, 0.0 }
 0x15e   : > { %v310_v63 = vrot.slane %v309_v61, 1  ;;  %381 = vperm.xlu1 %503, %v370_v62   ;;  %v312_v3 = vsel %vm297_vm7, %v304_v0, 0.0 }
 0x160   : > { %v311_v1 = vadd.f32 %v310_v63, %v309_v61 }
 0x162   : > { %v313_v4 = vsel %vm297_vm7, %v311_v1, 0.0 }
 0x163   : > { %v314_v5 = vadd.f32 %v313_v4, %v312_v3 }
 0x165   : > { %v368_v6 = vmul.f32 %v514_v2, %v314_v5 }
 0x167   : > { %374 = vperm.xlu0 %504, %v368_v6  }
 0x1dd   : > { %v382_v8 = vpop.permute.xlu1 %381 }
 0x1de   : > { %v384_v12 = vsel %vm378_vm12, %v382_v8, 0.0 }
 0x1e6   : > { %v375_v11 = vpop.permute.xlu0 %374 }
 0x1e7   : > { %v377_v13 = vsel %vm371_vm13, %v375_v11, 0.0 }
 0x1e8   : > { %v385_v15 = vadd.f32 %v384_v12, %v377_v13 }
 0x1ea   : > { %v388_v17 = vadd.f32 %v387_v16, %v385_v15 }
 0x1ec   : > { %389 = vst [vmem:[%s208_s27] sm:$0xff] %v388_v17 }
 0x1ed PF: > { %s13_s12 = sadd.s32 1, %s521_s12  }
 0x1ee   : > { %p10_p4 = scmp.ge.s32.totalorder %s13_s12, 5  }
 0x1f0   :  { %12 = sbr.rel (!%p10_p4) target bundleno = 1 (0x1), region = 68 }

</bundles_post_ra>
